<compile_context>
chip_gen: v6e
topology: v6e:2x2x1
jax: 0.10.0
libtpu: 0.0.40
codegen_flags: <defaults>
</compile_context>

<pallas_src>
import math

import jax
import jax.numpy as jnp
from jax.experimental import pallas as pl
from jax.experimental.pallas import tpu as pltpu


# ---------------------------------------------------------------------------
# Pallas kernels
# ---------------------------------------------------------------------------
def _compgcn_layer_kernel(
    x_ref, r_ref,
    src_in_ref, et_in_ref, dst_in_ref, norm_in_ref,
    src_out_ref, et_out_ref, dst_out_ref, norm_out_ref,
    in_w_ref, out_w_ref, loop_w_ref, w_rel_ref,
    loop_rel_ref, bn_scale_ref, bn_shift_ref,
    x_out_ref, r_out_ref,
):
    """One fused CompGCN layer (opn='mult'); whole graph resident in VMEM."""
    n_ent = x_ref.shape[0]
    n_rel2 = r_ref.shape[0]
    e_half = src_in_ref.shape[0]

    x = x_ref[...]                       # (N, Din)
    r = r_ref[...]                       # (2R, Din)

    # Iotas reused by both edge directions (VPU compares -> MXU matmuls).
    edge_node_iota = jax.lax.broadcasted_iota(jnp.int32, (e_half, n_ent), 1)
    edge_rel_iota = jax.lax.broadcasted_iota(jnp.int32, (e_half, n_rel2), 1)
    ent_edge_iota = jax.lax.broadcasted_iota(jnp.int32, (n_ent, e_half), 0)

    def direction_agg(src_r, et_r, dst_r, norm_r, w_r):
        # Gather x[src] and r[edge_type] via one-hot matmuls.
        h_src = jnp.dot((edge_node_iota == src_r[...]).astype(jnp.float32), x,
                        preferred_element_type=jnp.float32)         # (E/2, Din)
        r_edge = jnp.dot((edge_rel_iota == et_r[...]).astype(jnp.float32), r,
                         preferred_element_type=jnp.float32)        # (E/2, Din)
        # opn='mult' composition, then direction-specific projection.
        msg = jnp.dot(h_src * r_edge, w_r[...],
                      preferred_element_type=jnp.float32)           # (E/2, Dout)
        # Scatter-add over destination nodes; edge_norm folded into scatter.
        scat = (ent_edge_iota == dst_r[...]).astype(jnp.float32) * norm_r[...]
        return jnp.dot(scat, msg, preferred_element_type=jnp.float32)  # (N, Dout)

    agg = direction_agg(src_in_ref, et_in_ref, dst_in_ref, norm_in_ref,
                        in_w_ref)
    agg = agg + direction_agg(src_out_ref, et_out_ref, dst_out_ref,
                              norm_out_ref, out_w_ref)

    loop_msg = jnp.dot(x * loop_rel_ref[...], loop_w_ref[...],
                       preferred_element_type=jnp.float32)           # (N, Dout)

    h = (agg + loop_msg) * jnp.float32(1.0 / 3.0)
    # bias + eval-mode BatchNorm1d folded into a single per-feature affine.
    h = h * bn_scale_ref[...] + bn_shift_ref[...]
    x_out_ref[...] = h                     # act=None in KGGCN -> identity
    r_out_ref[...] = jnp.dot(r, w_rel_ref[...],
                             preferred_element_type=jnp.float32)


def _select_rows_kernel(idx_ref, table_ref, out_ref):
    """out[b] = table[idx[b]]  (torch.index_select) via a one-hot matmul."""
    n_rows = table_ref.shape[0]
    n_sel = out_ref.shape[0]
    row_iota = jax.lax.broadcasted_iota(jnp.int32, (n_sel, n_rows), 1)
    onehot = (row_iota == idx_ref[...]).astype(jnp.float32)
    out_ref[...] = jnp.dot(onehot, table_ref[...],
                           preferred_element_type=jnp.float32)


# ---------------------------------------------------------------------------
# Wrappers
# ---------------------------------------------------------------------------
def _full_spec(shape):
    ndim = len(shape)
    return pl.BlockSpec(shape, lambda i: (0,) * ndim)


def compgcn_layer_pallas(x, r, src, dst, etype, norm, lp, eps=1e-5):
    n_ent, _ = x.shape
    n_rel2 = r.shape[0]
    e_half = src.shape[0] // 2
    d_out = lp["in_w"].shape[1]

    # Split edges into the original ('in') and inverse ('out') halves, shaped
    # so the kernel's broadcasts are pure lane / sublane broadcasts.
    src_in = src[:e_half].reshape(e_half, 1)
    et_in = etype[:e_half].reshape(e_half, 1)
    dst_in = dst[:e_half].reshape(1, e_half)
    norm_in = norm[:e_half].reshape(1, e_half)
    src_out = src[e_half:].reshape(e_half, 1)
    et_out = etype[e_half:].reshape(e_half, 1)
    dst_out = dst[e_half:].reshape(1, e_half)
    norm_out = norm[e_half:].reshape(1, e_half)

    # Fold bias + eval-mode BatchNorm into one affine (parameter preprocessing).
    bn_scale = lp["bn_gamma"] * jax.lax.rsqrt(lp["bn_var"] + eps)
    bn_shift = (lp["bias"] - lp["bn_mean"]) * bn_scale + lp["bn_beta"]

    operands = (
        x, r,
        src_in, et_in, dst_in, norm_in,
        src_out, et_out, dst_out, norm_out,
        lp["in_w"], lp["out_w"], lp["loop_w"], lp["w_rel"],
        lp["loop_rel"],
        bn_scale.reshape(1, d_out), bn_shift.reshape(1, d_out),
    )

    return pl.pallas_call(
        _compgcn_layer_kernel,
        out_shape=(
            jax.ShapeDtypeStruct((n_ent, d_out), jnp.float32),
            jax.ShapeDtypeStruct((n_rel2, d_out), jnp.float32),
        ),
        grid=(1,),
        in_specs=[_full_spec(op.shape) for op in operands],
        out_specs=(_full_spec((n_ent, d_out)), _full_spec((n_rel2, d_out))),
        compiler_params=pltpu.CompilerParams(
            dimension_semantics=("arbitrary",)),
    )(*operands)


def select_rows_pallas(table, idx):
    n_rows, d = table.shape
    n_sel = idx.shape[0]
    idx2 = idx.reshape(n_sel, 1).astype(jnp.int32)
    return pl.pallas_call(
        _select_rows_kernel,
        out_shape=jax.ShapeDtypeStruct((n_sel, d), jnp.float32),
        grid=(1,),
        in_specs=[_full_spec((n_sel, 1)), _full_spec((n_rows, d))],
        out_specs=_full_spec((n_sel, d)),
        compiler_params=pltpu.CompilerParams(
            dimension_semantics=("arbitrary",)),
    )(idx2, table)


@jax.jit
def kggcn_forward(params, src, dst, etype, norm, subj, rel):
    x = params["init_embed"]
    r = params["init_rel"]
    for lp in params["layers"]:
        x, r = compgcn_layer_pallas(x, r, src, dst, etype, norm, lp)
        # Dropout(gcn_drop=0.0) after each layer is the identity here.
    sub_emb = select_rows_pallas(x, subj)
    rel_emb = select_rows_pallas(r, rel)
    return sub_emb, rel_emb, x


# ---------------------------------------------------------------------------
# Pure-JAX reference (mirrors the torch forward, inference mode)
# ---------------------------------------------------------------------------
def _layer_reference(x, r, src, dst, etype, norm, lp, eps=1e-5):
    e_half = src.shape[0] // 2
    comp = x[src] * r[etype]
    msg = jnp.concatenate(
        [comp[:e_half] @ lp["in_w"], comp[e_half:] @ lp["out_w"]], axis=0)
    msg = msg * norm[:, None]
    agg = jax.ops.segment_sum(msg, dst, num_segments=x.shape[0]) / 3.0
    loop = (x * lp["loop_rel"]) @ lp["loop_w"] / 3.0
    h = agg + loop + lp["bias"][None, :]
    h = ((h - lp["bn_mean"]) / jnp.sqrt(lp["bn_var"] + eps)
         * lp["bn_gamma"] + lp["bn_beta"])
    return h, r @ lp["w_rel"]


def _reference_forward(params, src, dst, etype, norm, subj, rel):
    x = params["init_embed"]
    r = params["init_rel"]
    for lp in params["layers"]:
        x, r = _layer_reference(x, r, src, dst, etype, norm, lp)
    return x[subj], r[rel], x


# ---------------------------------------------------------------------------
# Parameter / graph construction
# ---------------------------------------------------------------------------
def _xavier_normal(key, shape, gain=1.0):
    fan_in, fan_out = shape[0], shape[1]
    std = gain * math.sqrt(2.0 / (fan_in + fan_out))
    return std * jax.random.normal(key, shape, dtype=jnp.float32)


def make_params(key, num_ent, num_rel, gcn_layers, init_dim, gcn_dim):
    keys = jax.random.split(key, 2 + 5 * gcn_layers)
    relu_gain = math.sqrt(2.0)
    params = {
        "init_embed": _xavier_normal(keys[0], (num_ent, init_dim), relu_gain),
        "init_rel": _xavier_normal(keys[1], (2 * num_rel, init_dim), relu_gain),
        "layers": [],
    }
    k = 2
    for li in range(gcn_layers):
        d_in = init_dim if li == 0 else gcn_dim
        d_out = gcn_dim
        params["layers"].append({
            "in_w": _xavier_normal(keys[k + 0], (d_in, d_out)),
            "out_w": _xavier_normal(keys[k + 1], (d_in, d_out)),
            "loop_w": _xavier_normal(keys[k + 2], (d_in, d_out)),
            "w_rel": _xavier_normal(keys[k + 3], (d_in, d_out)),
            "loop_rel": _xavier_normal(keys[k + 4], (1, d_in)),
            "bias": jnp.zeros((d_out,), jnp.float32),
            "bn_gamma": jnp.ones((d_out,), jnp.float32),
            "bn_beta": jnp.zeros((d_out,), jnp.float32),
            "bn_mean": jnp.zeros((d_out,), jnp.float32),
            "bn_var": jnp.ones((d_out,), jnp.float32),
        })
        k += 5
    return params


def _assert_close(name, got, want, tol=0.08):
    err = float(jnp.max(jnp.abs(got - want)))
    scale = float(jnp.max(jnp.abs(want))) + 1e-6
    assert err <= tol * scale, f"{name}: max|diff|={err:.3e} scale={scale:.3e}"


if __name__ == "__main__":
    num_ent, num_rel = 16, 4
    num_edges = 16                   # edges per direction (32 incl. inverse)
    init_dim = gcn_dim = 128         # lane-dense feature dims
    gcn_layers = 2
    batch = 2

    root = jax.random.PRNGKey(0)
    kp, k1, k2, k3, k4, k5 = jax.random.split(root, 6)

    params = make_params(kp, num_ent, num_rel, gcn_layers, init_dim, gcn_dim)

    # Graph: original edges + inverse edges (relation id shifted by num_rel).
    src0 = jax.random.randint(k1, (num_edges,), 0, num_ent, dtype=jnp.int32)
    dst0 = jax.random.randint(k2, (num_edges,), 0, num_ent, dtype=jnp.int32)
    et0 = jax.random.randint(k3, (num_edges,), 0, num_rel, dtype=jnp.int32)
    src = jnp.concatenate([src0, dst0])
    dst = jnp.concatenate([dst0, src0])
    etype = jnp.concatenate([et0, et0 + num_rel])
    deg = jnp.zeros((num_ent,), jnp.float32).at[dst].add(1.0)
    norm = (1.0 / jnp.maximum(deg, 1.0))[dst]        # edge_norm = 1 / in-degree

    subj = jax.random.randint(k4, (batch,), 0, num_ent, dtype=jnp.int32)
    rel = jax.random.randint(k5, (batch,), 0, 2 * num_rel, dtype=jnp.int32)

    sub_emb, rel_emb, x_final = jax.block_until_ready(
        kggcn_forward(params, src, dst, etype, norm, subj, rel))

    ref_sub, ref_rel, ref_x = _reference_forward(
        params, src, dst, etype, norm, subj, rel)

    assert sub_emb.shape == (batch, gcn_dim) and sub_emb.dtype == jnp.float32
    assert rel_emb.shape == (batch, gcn_dim) and rel_emb.dtype == jnp.float32
    assert x_final.shape == (num_ent, gcn_dim) and x_final.dtype == jnp.float32
    _assert_close("sub_emb", sub_emb, ref_sub)
    _assert_close("rel_emb", rel_emb, ref_rel)
    _assert_close("x_final", x_final, ref_x)

    print("KERNEL_OK")
</pallas_src>

<mosaic_0001>
module attributes {stable_mosaic.version = 11 : i64} {
  func.func @_compgcn_layer_kernel(%arg0: i32, %arg1: memref<16x128xf32, #tpu.memory_space<vmem>>, %arg2: memref<8x128xf32, #tpu.memory_space<vmem>>, %arg3: memref<16x1xi32, #tpu.memory_space<vmem>>, %arg4: memref<16x1xi32, #tpu.memory_space<vmem>>, %arg5: memref<1x16xi32, #tpu.memory_space<vmem>>, %arg6: memref<1x16xf32, #tpu.memory_space<vmem>>, %arg7: memref<16x1xi32, #tpu.memory_space<vmem>>, %arg8: memref<16x1xi32, #tpu.memory_space<vmem>>, %arg9: memref<1x16xi32, #tpu.memory_space<vmem>>, %arg10: memref<1x16xf32, #tpu.memory_space<vmem>>, %arg11: memref<128x128xf32, #tpu.memory_space<vmem>>, %arg12: memref<128x128xf32, #tpu.memory_space<vmem>>, %arg13: memref<128x128xf32, #tpu.memory_space<vmem>>, %arg14: memref<128x128xf32, #tpu.memory_space<vmem>>, %arg15: memref<1x128xf32, #tpu.memory_space<vmem>>, %arg16: memref<1x128xf32, #tpu.memory_space<vmem>>, %arg17: memref<1x128xf32, #tpu.memory_space<vmem>>, %arg18: memref<16x128xf32, #tpu.memory_space<vmem>>, %arg19: memref<8x128xf32, #tpu.memory_space<vmem>>) attributes {dimension_semantics = [#tpu.dimension_semantics<arbitrary>], iteration_bounds = array<i64: 1>, scalar_prefetch = 0 : i64, scratch_operands = 0 : i64, tpu.core_type = #tpu.core_type<tc>, window_params = [{pipeline_mode = #tpu.pipeline_mode<synchronous>, transform_indices = @transform_0, window_bounds = array<i64: 16, 128>}, {pipeline_mode = #tpu.pipeline_mode<synchronous>, transform_indices = @transform_1, window_bounds = array<i64: 8, 128>}, {pipeline_mode = #tpu.pipeline_mode<synchronous>, transform_indices = @transform_2, window_bounds = array<i64: 16, 1>}, {pipeline_mode = #tpu.pipeline_mode<synchronous>, transform_indices = @transform_3, window_bounds = array<i64: 16, 1>}, {pipeline_mode = #tpu.pipeline_mode<synchronous>, transform_indices = @transform_4, window_bounds = array<i64: 1, 16>}, {pipeline_mode = #tpu.pipeline_mode<synchronous>, transform_indices = @transform_5, window_bounds = array<i64: 1, 16>}, {pipeline_mode = #tpu.pipeline_mode<synchronous>, transform_indices = @transform_6, window_bounds = array<i64: 16, 1>}, {pipeline_mode = #tpu.pipeline_mode<synchronous>, transform_indices = @transform_7, window_bounds = array<i64: 16, 1>}, {pipeline_mode = #tpu.pipeline_mode<synchronous>, transform_indices = @transform_8, window_bounds = array<i64: 1, 16>}, {pipeline_mode = #tpu.pipeline_mode<synchronous>, transform_indices = @transform_9, window_bounds = array<i64: 1, 16>}, {pipeline_mode = #tpu.pipeline_mode<synchronous>, transform_indices = @transform_10, window_bounds = array<i64: 128, 128>}, {pipeline_mode = #tpu.pipeline_mode<synchronous>, transform_indices = @transform_11, window_bounds = array<i64: 128, 128>}, {pipeline_mode = #tpu.pipeline_mode<synchronous>, transform_indices = @transform_12, window_bounds = array<i64: 128, 128>}, {pipeline_mode = #tpu.pipeline_mode<synchronous>, transform_indices = @transform_13, window_bounds = array<i64: 128, 128>}, {pipeline_mode = #tpu.pipeline_mode<synchronous>, transform_indices = @transform_14, window_bounds = array<i64: 1, 128>}, {pipeline_mode = #tpu.pipeline_mode<synchronous>, transform_indices = @transform_15, window_bounds = array<i64: 1, 128>}, {pipeline_mode = #tpu.pipeline_mode<synchronous>, transform_indices = @transform_16, window_bounds = array<i64: 1, 128>}, {pipeline_mode = #tpu.pipeline_mode<synchronous>, transform_indices = @transform_17, window_bounds = array<i64: 16, 128>}, {pipeline_mode = #tpu.pipeline_mode<synchronous>, transform_indices = @transform_18, window_bounds = array<i64: 8, 128>}]} {
    %c0 = arith.constant 0 : index
    %c0_0 = arith.constant 0 : index
    %0 = vector.load %arg1[%c0, %c0_0] : memref<16x128xf32, #tpu.memory_space<vmem>>, vector<16x128xf32>
    %c0_1 = arith.constant 0 : index
    %c0_2 = arith.constant 0 : index
    %1 = vector.load %arg2[%c0_1, %c0_2] : memref<8x128xf32, #tpu.memory_space<vmem>>, vector<8x128xf32>
    %2 = tpu.iota {dimensions = array<i32: 1>} : vector<16x16xi32>
    %3 = tpu.iota {dimensions = array<i32: 1>} : vector<16x8xi32>
    %4 = tpu.iota {dimensions = array<i32: 0>} : vector<16x16xi32>
    %c0_3 = arith.constant 0 : index
    %c0_4 = arith.constant 0 : index
    %5 = vector.load %arg3[%c0_3, %c0_4] : memref<16x1xi32, #tpu.memory_space<vmem>>, vector<16x1xi32>
    %6 = vector.broadcast %5 : vector<16x1xi32> to vector<16x16xi32>
    %7 = arith.cmpi eq, %2, %6 : vector<16x16xi32>
    %8 = arith.extui %7 : vector<16x16xi1> to vector<16x16xi32>
    %9 = arith.sitofp %8 : vector<16x16xi32> to vector<16x16xf32>
    %cst = arith.constant dense<0.000000e+00> : vector<16x128xf32>
    %10 = tpu.matmul %9, %0, %cst {dimension_numbers = #tpu.dot_dimension_numbers<[1], [0], [0], [1], [0, 0, 1, 1], [], []>} : vector<16x16xf32>, vector<16x128xf32>, vector<16x128xf32> -> vector<16x128xf32>
    %c0_5 = arith.constant 0 : index
    %c0_6 = arith.constant 0 : index
    %11 = vector.load %arg4[%c0_5, %c0_6] : memref<16x1xi32, #tpu.memory_space<vmem>>, vector<16x1xi32>
    %12 = vector.broadcast %11 : vector<16x1xi32> to vector<16x8xi32>
    %13 = arith.cmpi eq, %3, %12 : vector<16x8xi32>
    %14 = arith.extui %13 : vector<16x8xi1> to vector<16x8xi32>
    %15 = arith.sitofp %14 : vector<16x8xi32> to vector<16x8xf32>
    %cst_7 = arith.constant dense<0.000000e+00> : vector<16x128xf32>
    %16 = tpu.matmul %15, %1, %cst_7 {dimension_numbers = #tpu.dot_dimension_numbers<[1], [0], [0], [1], [0, 0, 1, 1], [], []>} : vector<16x8xf32>, vector<8x128xf32>, vector<16x128xf32> -> vector<16x128xf32>
    %17 = arith.mulf %10, %16 : vector<16x128xf32>
    %c0_8 = arith.constant 0 : index
    %c0_9 = arith.constant 0 : index
    %18 = vector.load %arg11[%c0_8, %c0_9] : memref<128x128xf32, #tpu.memory_space<vmem>>, vector<128x128xf32>
    %cst_10 = arith.constant dense<0.000000e+00> : vector<16x128xf32>
    %19 = tpu.matmul %17, %18, %cst_10 {dimension_numbers = #tpu.dot_dimension_numbers<[1], [0], [0], [1], [0, 0, 1, 1], [], []>} : vector<16x128xf32>, vector<128x128xf32>, vector<16x128xf32> -> vector<16x128xf32>
    %c0_11 = arith.constant 0 : index
    %c0_12 = arith.constant 0 : index
    %20 = vector.load %arg5[%c0_11, %c0_12] : memref<1x16xi32, #tpu.memory_space<vmem>>, vector<1x16xi32>
    %21 = vector.broadcast %20 : vector<1x16xi32> to vector<16x16xi32>
    %22 = arith.cmpi eq, %4, %21 : vector<16x16xi32>
    %23 = arith.extui %22 : vector<16x16xi1> to vector<16x16xi32>
    %24 = arith.sitofp %23 : vector<16x16xi32> to vector<16x16xf32>
    %c0_13 = arith.constant 0 : index
    %c0_14 = arith.constant 0 : index
    %25 = vector.load %arg6[%c0_13, %c0_14] : memref<1x16xf32, #tpu.memory_space<vmem>>, vector<1x16xf32>
    %26 = vector.broadcast %25 : vector<1x16xf32> to vector<16x16xf32>
    %27 = arith.mulf %24, %26 : vector<16x16xf32>
    %cst_15 = arith.constant dense<0.000000e+00> : vector<16x128xf32>
    %28 = tpu.matmul %27, %19, %cst_15 {dimension_numbers = #tpu.dot_dimension_numbers<[1], [0], [0], [1], [0, 0, 1, 1], [], []>} : vector<16x16xf32>, vector<16x128xf32>, vector<16x128xf32> -> vector<16x128xf32>
    %c0_16 = arith.constant 0 : index
    %c0_17 = arith.constant 0 : index
    %29 = vector.load %arg7[%c0_16, %c0_17] : memref<16x1xi32, #tpu.memory_space<vmem>>, vector<16x1xi32>
    %30 = vector.broadcast %29 : vector<16x1xi32> to vector<16x16xi32>
    %31 = arith.cmpi eq, %2, %30 : vector<16x16xi32>
    %32 = arith.extui %31 : vector<16x16xi1> to vector<16x16xi32>
    %33 = arith.sitofp %32 : vector<16x16xi32> to vector<16x16xf32>
    %cst_18 = arith.constant dense<0.000000e+00> : vector<16x128xf32>
    %34 = tpu.matmul %33, %0, %cst_18 {dimension_numbers = #tpu.dot_dimension_numbers<[1], [0], [0], [1], [0, 0, 1, 1], [], []>} : vector<16x16xf32>, vector<16x128xf32>, vector<16x128xf32> -> vector<16x128xf32>
    %c0_19 = arith.constant 0 : index
    %c0_20 = arith.constant 0 : index
    %35 = vector.load %arg8[%c0_19, %c0_20] : memref<16x1xi32, #tpu.memory_space<vmem>>, vector<16x1xi32>
    %36 = vector.broadcast %35 : vector<16x1xi32> to vector<16x8xi32>
    %37 = arith.cmpi eq, %3, %36 : vector<16x8xi32>
    %38 = arith.extui %37 : vector<16x8xi1> to vector<16x8xi32>
    %39 = arith.sitofp %38 : vector<16x8xi32> to vector<16x8xf32>
    %cst_21 = arith.constant dense<0.000000e+00> : vector<16x128xf32>
    %40 = tpu.matmul %39, %1, %cst_21 {dimension_numbers = #tpu.dot_dimension_numbers<[1], [0], [0], [1], [0, 0, 1, 1], [], []>} : vector<16x8xf32>, vector<8x128xf32>, vector<16x128xf32> -> vector<16x128xf32>
    %41 = arith.mulf %34, %40 : vector<16x128xf32>
    %c0_22 = arith.constant 0 : index
    %c0_23 = arith.constant 0 : index
    %42 = vector.load %arg12[%c0_22, %c0_23] : memref<128x128xf32, #tpu.memory_space<vmem>>, vector<128x128xf32>
    %cst_24 = arith.constant dense<0.000000e+00> : vector<16x128xf32>
    %43 = tpu.matmul %41, %42, %cst_24 {dimension_numbers = #tpu.dot_dimension_numbers<[1], [0], [0], [1], [0, 0, 1, 1], [], []>} : vector<16x128xf32>, vector<128x128xf32>, vector<16x128xf32> -> vector<16x128xf32>
    %c0_25 = arith.constant 0 : index
    %c0_26 = arith.constant 0 : index
    %44 = vector.load %arg9[%c0_25, %c0_26] : memref<1x16xi32, #tpu.memory_space<vmem>>, vector<1x16xi32>
    %45 = vector.broadcast %44 : vector<1x16xi32> to vector<16x16xi32>
    %46 = arith.cmpi eq, %4, %45 : vector<16x16xi32>
    %47 = arith.extui %46 : vector<16x16xi1> to vector<16x16xi32>
    %48 = arith.sitofp %47 : vector<16x16xi32> to vector<16x16xf32>
    %c0_27 = arith.constant 0 : index
    %c0_28 = arith.constant 0 : index
    %49 = vector.load %arg10[%c0_27, %c0_28] : memref<1x16xf32, #tpu.memory_space<vmem>>, vector<1x16xf32>
    %50 = vector.broadcast %49 : vector<1x16xf32> to vector<16x16xf32>
    %51 = arith.mulf %48, %50 : vector<16x16xf32>
    %cst_29 = arith.constant dense<0.000000e+00> : vector<16x128xf32>
    %52 = tpu.matmul %51, %43, %cst_29 {dimension_numbers = #tpu.dot_dimension_numbers<[1], [0], [0], [1], [0, 0, 1, 1], [], []>} : vector<16x16xf32>, vector<16x128xf32>, vector<16x128xf32> -> vector<16x128xf32>
    %53 = arith.addf %28, %52 : vector<16x128xf32>
    %c0_30 = arith.constant 0 : index
    %c0_31 = arith.constant 0 : index
    %54 = vector.load %arg15[%c0_30, %c0_31] : memref<1x128xf32, #tpu.memory_space<vmem>>, vector<1x128xf32>
    %55 = vector.broadcast %54 : vector<1x128xf32> to vector<16x128xf32>
    %56 = arith.mulf %0, %55 : vector<16x128xf32>
    %c0_32 = arith.constant 0 : index
    %c0_33 = arith.constant 0 : index
    %57 = vector.load %arg13[%c0_32, %c0_33] : memref<128x128xf32, #tpu.memory_space<vmem>>, vector<128x128xf32>
    %cst_34 = arith.constant dense<0.000000e+00> : vector<16x128xf32>
    %58 = tpu.matmul %56, %57, %cst_34 {dimension_numbers = #tpu.dot_dimension_numbers<[1], [0], [0], [1], [0, 0, 1, 1], [], []>} : vector<16x128xf32>, vector<128x128xf32>, vector<16x128xf32> -> vector<16x128xf32>
    %59 = arith.addf %53, %58 : vector<16x128xf32>
    %cst_35 = arith.constant 0.333333343 : f32
    %60 = vector.broadcast %cst_35 : f32 to vector<16x128xf32>
    %61 = arith.mulf %59, %60 : vector<16x128xf32>
    %c0_36 = arith.constant 0 : index
    %c0_37 = arith.constant 0 : index
    %62 = vector.load %arg16[%c0_36, %c0_37] : memref<1x128xf32, #tpu.memory_space<vmem>>, vector<1x128xf32>
    %63 = vector.broadcast %62 : vector<1x128xf32> to vector<16x128xf32>
    %64 = arith.mulf %61, %63 : vector<16x128xf32>
    %c0_38 = arith.constant 0 : index
    %c0_39 = arith.constant 0 : index
    %65 = vector.load %arg17[%c0_38, %c0_39] : memref<1x128xf32, #tpu.memory_space<vmem>>, vector<1x128xf32>
    %66 = vector.broadcast %65 : vector<1x128xf32> to vector<16x128xf32>
    %67 = arith.addf %64, %66 : vector<16x128xf32>
    %c0_40 = arith.constant 0 : index
    %c0_41 = arith.constant 0 : index
    %68 = vector.load %arg18[%c0_40, %c0_41] : memref<16x128xf32, #tpu.memory_space<vmem>>, vector<16x128xf32>
    tpu.vector_store %arg18[%c0_40, %c0_41], %67 {strides = array<i32>} : memref<16x128xf32, #tpu.memory_space<vmem>>, vector<16x128xf32>,
    %c0_42 = arith.constant 0 : index
    %c0_43 = arith.constant 0 : index
    %69 = vector.load %arg14[%c0_42, %c0_43] : memref<128x128xf32, #tpu.memory_space<vmem>>, vector<128x128xf32>
    %cst_44 = arith.constant dense<0.000000e+00> : vector<8x128xf32>
    %70 = tpu.matmul %1, %69, %cst_44 {dimension_numbers = #tpu.dot_dimension_numbers<[1], [0], [0], [1], [0, 0, 1, 1], [], []>} : vector<8x128xf32>, vector<128x128xf32>, vector<8x128xf32> -> vector<8x128xf32>
    %c0_45 = arith.constant 0 : index
    %c0_46 = arith.constant 0 : index
    %71 = vector.load %arg19[%c0_45, %c0_46] : memref<8x128xf32, #tpu.memory_space<vmem>>, vector<8x128xf32>
    tpu.vector_store %arg19[%c0_45, %c0_46], %70 {strides = array<i32>} : memref<8x128xf32, #tpu.memory_space<vmem>>, vector<8x128xf32>,
    return
  }
  func.func @transform_0(%arg0: i32) -> (i32, i32) {
    %c0_i32 = arith.constant 0 : i32
    %c0_i32_0 = arith.constant 0 : i32
    %c0_i32_1 = arith.constant 0 : i32
    return %c0_i32, %c0_i32_0 : i32, i32
  }
  func.func @transform_1(%arg0: i32) -> (i32, i32) {
    %c0_i32 = arith.constant 0 : i32
    %c0_i32_0 = arith.constant 0 : i32
    %c0_i32_1 = arith.constant 0 : i32
    return %c0_i32, %c0_i32_0 : i32, i32
  }
  func.func @transform_2(%arg0: i32) -> (i32, i32) {
    %c0_i32 = arith.constant 0 : i32
    %c0_i32_0 = arith.constant 0 : i32
    %c0_i32_1 = arith.constant 0 : i32
    return %c0_i32, %c0_i32_0 : i32, i32
  }
  func.func @transform_3(%arg0: i32) -> (i32, i32) {
    %c0_i32 = arith.constant 0 : i32
    %c0_i32_0 = arith.constant 0 : i32
    %c0_i32_1 = arith.constant 0 : i32
    return %c0_i32, %c0_i32_0 : i32, i32
  }
  func.func @transform_4(%arg0: i32) -> (i32, i32) {
    %c0_i32 = arith.constant 0 : i32
    %c0_i32_0 = arith.constant 0 : i32
    %c0_i32_1 = arith.constant 0 : i32
    return %c0_i32, %c0_i32_0 : i32, i32
  }
  func.func @transform_5(%arg0: i32) -> (i32, i32) {
    %c0_i32 = arith.constant 0 : i32
    %c0_i32_0 = arith.constant 0 : i32
    %c0_i32_1 = arith.constant 0 : i32
    return %c0_i32, %c0_i32_0 : i32, i32
  }
  func.func @transform_6(%arg0: i32) -> (i32, i32) {
    %c0_i32 = arith.constant 0 : i32
    %c0_i32_0 = arith.constant 0 : i32
    %c0_i32_1 = arith.constant 0 : i32
    return %c0_i32, %c0_i32_0 : i32, i32
  }
  func.func @transform_7(%arg0: i32) -> (i32, i32) {
    %c0_i32 = arith.constant 0 : i32
    %c0_i32_0 = arith.constant 0 : i32
    %c0_i32_1 = arith.constant 0 : i32
    return %c0_i32, %c0_i32_0 : i32, i32
  }
  func.func @transform_8(%arg0: i32) -> (i32, i32) {
    %c0_i32 = arith.constant 0 : i32
    %c0_i32_0 = arith.constant 0 : i32
    %c0_i32_1 = arith.constant 0 : i32
    return %c0_i32, %c0_i32_0 : i32, i32
  }
  func.func @transform_9(%arg0: i32) -> (i32, i32) {
    %c0_i32 = arith.constant 0 : i32
    %c0_i32_0 = arith.constant 0 : i32
    %c0_i32_1 = arith.constant 0 : i32
    return %c0_i32, %c0_i32_0 : i32, i32
  }
  func.func @transform_10(%arg0: i32) -> (i32, i32) {
    %c0_i32 = arith.constant 0 : i32
    %c0_i32_0 = arith.constant 0 : i32
    %c0_i32_1 = arith.constant 0 : i32
    return %c0_i32, %c0_i32_0 : i32, i32
  }
  func.func @transform_11(%arg0: i32) -> (i32, i32) {
    %c0_i32 = arith.constant 0 : i32
    %c0_i32_0 = arith.constant 0 : i32
    %c0_i32_1 = arith.constant 0 : i32
    return %c0_i32, %c0_i32_0 : i32, i32
  }
  func.func @transform_12(%arg0: i32) -> (i32, i32) {
    %c0_i32 = arith.constant 0 : i32
    %c0_i32_0 = arith.constant 0 : i32
    %c0_i32_1 = arith.constant 0 : i32
    return %c0_i32, %c0_i32_0 : i32, i32
  }
  func.func @transform_13(%arg0: i32) -> (i32, i32) {
    %c0_i32 = arith.constant 0 : i32
    %c0_i32_0 = arith.constant 0 : i32
    %c0_i32_1 = arith.constant 0 : i32
    return %c0_i32, %c0_i32_0 : i32, i32
  }
  func.func @transform_14(%arg0: i32) -> (i32, i32) {
    %c0_i32 = arith.constant 0 : i32
    %c0_i32_0 = arith.constant 0 : i32
    %c0_i32_1 = arith.constant 0 : i32
    return %c0_i32, %c0_i32_0 : i32, i32
  }
  func.func @transform_15(%arg0: i32) -> (i32, i32) {
    %c0_i32 = arith.constant 0 : i32
    %c0_i32_0 = arith.constant 0 : i32
    %c0_i32_1 = arith.constant 0 : i32
    return %c0_i32, %c0_i32_0 : i32, i32
  }
  func.func @transform_16(%arg0: i32) -> (i32, i32) {
    %c0_i32 = arith.constant 0 : i32
    %c0_i32_0 = arith.constant 0 : i32
    %c0_i32_1 = arith.constant 0 : i32
    return %c0_i32, %c0_i32_0 : i32, i32
  }
  func.func @transform_17(%arg0: i32) -> (i32, i32) {
    %c0_i32 = arith.constant 0 : i32
    %c0_i32_0 = arith.constant 0 : i32
    %c0_i32_1 = arith.constant 0 : i32
    return %c0_i32, %c0_i32_0 : i32, i32
  }
  func.func @transform_18(%arg0: i32) -> (i32, i32) {
    %c0_i32 = arith.constant 0 : i32
    %c0_i32_0 = arith.constant 0 : i32
    %c0_i32_1 = arith.constant 0 : i32
    return %c0_i32, %c0_i32_0 : i32, i32
  }
}

module attributes {stable_mosaic.version = 11 : i64} {
  func.func @_select_rows_kernel(%arg0: i32, %arg1: memref<2x1xi32, #tpu.memory_space<vmem>>, %arg2: memref<16x128xf32, #tpu.memory_space<vmem>>, %arg3: memref<2x128xf32, #tpu.memory_space<vmem>>) attributes {dimension_semantics = [#tpu.dimension_semantics<arbitrary>], iteration_bounds = array<i64: 1>, scalar_prefetch = 0 : i64, scratch_operands = 0 : i64, tpu.core_type = #tpu.core_type<tc>, window_params = [{pipeline_mode = #tpu.pipeline_mode<synchronous>, transform_indices = @transform_0, window_bounds = array<i64: 2, 1>}, {pipeline_mode = #tpu.pipeline_mode<synchronous>, transform_indices = @transform_1, window_bounds = array<i64: 16, 128>}, {pipeline_mode = #tpu.pipeline_mode<synchronous>, transform_indices = @transform_2, window_bounds = array<i64: 2, 128>}]} {
    %0 = tpu.iota {dimensions = array<i32: 1>} : vector<2x16xi32>
    %c0 = arith.constant 0 : index
    %c0_0 = arith.constant 0 : index
    %1 = vector.load %arg1[%c0, %c0_0] : memref<2x1xi32, #tpu.memory_space<vmem>>, vector<2x1xi32>
    %2 = vector.broadcast %1 : vector<2x1xi32> to vector<2x16xi32>
    %3 = arith.cmpi eq, %0, %2 : vector<2x16xi32>
    %4 = arith.extui %3 : vector<2x16xi1> to vector<2x16xi32>
    %5 = arith.sitofp %4 : vector<2x16xi32> to vector<2x16xf32>
    %c0_1 = arith.constant 0 : index
    %c0_2 = arith.constant 0 : index
    %6 = vector.load %arg2[%c0_1, %c0_2] : memref<16x128xf32, #tpu.memory_space<vmem>>, vector<16x128xf32>
    %cst = arith.constant dense<0.000000e+00> : vector<2x128xf32>
    %7 = tpu.matmul %5, %6, %cst {dimension_numbers = #tpu.dot_dimension_numbers<[1], [0], [0], [1], [0, 0, 1, 1], [], []>} : vector<2x16xf32>, vector<16x128xf32>, vector<2x128xf32> -> vector<2x128xf32>
    %c0_3 = arith.constant 0 : index
    %c0_4 = arith.constant 0 : index
    %8 = vector.load %arg3[%c0_3, %c0_4] : memref<2x128xf32, #tpu.memory_space<vmem>>, vector<2x128xf32>
    tpu.vector_store %arg3[%c0_3, %c0_4], %7 {strides = array<i32>} : memref<2x128xf32, #tpu.memory_space<vmem>>, vector<2x128xf32>,
    return
  }
  func.func @transform_0(%arg0: i32) -> (i32, i32) {
    %c0_i32 = arith.constant 0 : i32
    %c0_i32_0 = arith.constant 0 : i32
    %c0_i32_1 = arith.constant 0 : i32
    return %c0_i32, %c0_i32_0 : i32, i32
  }
  func.func @transform_1(%arg0: i32) -> (i32, i32) {
    %c0_i32 = arith.constant 0 : i32
    %c0_i32_0 = arith.constant 0 : i32
    %c0_i32_1 = arith.constant 0 : i32
    return %c0_i32, %c0_i32_0 : i32, i32
  }
  func.func @transform_2(%arg0: i32) -> (i32, i32) {
    %c0_i32 = arith.constant 0 : i32
    %c0_i32_0 = arith.constant 0 : i32
    %c0_i32_1 = arith.constant 0 : i32
    return %c0_i32, %c0_i32_0 : i32, i32
  }
}

module attributes {stable_mosaic.version = 11 : i64} {
  func.func @_select_rows_kernel(%arg0: i32, %arg1: memref<2x1xi32, #tpu.memory_space<vmem>>, %arg2: memref<8x128xf32, #tpu.memory_space<vmem>>, %arg3: memref<2x128xf32, #tpu.memory_space<vmem>>) attributes {dimension_semantics = [#tpu.dimension_semantics<arbitrary>], iteration_bounds = array<i64: 1>, scalar_prefetch = 0 : i64, scratch_operands = 0 : i64, tpu.core_type = #tpu.core_type<tc>, window_params = [{pipeline_mode = #tpu.pipeline_mode<synchronous>, transform_indices = @transform_0, window_bounds = array<i64: 2, 1>}, {pipeline_mode = #tpu.pipeline_mode<synchronous>, transform_indices = @transform_1, window_bounds = array<i64: 8, 128>}, {pipeline_mode = #tpu.pipeline_mode<synchronous>, transform_indices = @transform_2, window_bounds = array<i64: 2, 128>}]} {
    %0 = tpu.iota {dimensions = array<i32: 1>} : vector<2x8xi32>
    %c0 = arith.constant 0 : index
    %c0_0 = arith.constant 0 : index
    %1 = vector.load %arg1[%c0, %c0_0] : memref<2x1xi32, #tpu.memory_space<vmem>>, vector<2x1xi32>
    %2 = vector.broadcast %1 : vector<2x1xi32> to vector<2x8xi32>
    %3 = arith.cmpi eq, %0, %2 : vector<2x8xi32>
    %4 = arith.extui %3 : vector<2x8xi1> to vector<2x8xi32>
    %5 = arith.sitofp %4 : vector<2x8xi32> to vector<2x8xf32>
    %c0_1 = arith.constant 0 : index
    %c0_2 = arith.constant 0 : index
    %6 = vector.load %arg2[%c0_1, %c0_2] : memref<8x128xf32, #tpu.memory_space<vmem>>, vector<8x128xf32>
    %cst = arith.constant dense<0.000000e+00> : vector<2x128xf32>
    %7 = tpu.matmul %5, %6, %cst {dimension_numbers = #tpu.dot_dimension_numbers<[1], [0], [0], [1], [0, 0, 1, 1], [], []>} : vector<2x8xf32>, vector<8x128xf32>, vector<2x128xf32> -> vector<2x128xf32>
    %c0_3 = arith.constant 0 : index
    %c0_4 = arith.constant 0 : index
    %8 = vector.load %arg3[%c0_3, %c0_4] : memref<2x128xf32, #tpu.memory_space<vmem>>, vector<2x128xf32>
    tpu.vector_store %arg3[%c0_3, %c0_4], %7 {strides = array<i32>} : memref<2x128xf32, #tpu.memory_space<vmem>>, vector<2x128xf32>,
    return
  }
  func.func @transform_0(%arg0: i32) -> (i32, i32) {
    %c0_i32 = arith.constant 0 : i32
    %c0_i32_0 = arith.constant 0 : i32
    %c0_i32_1 = arith.constant 0 : i32
    return %c0_i32, %c0_i32_0 : i32, i32
  }
  func.func @transform_1(%arg0: i32) -> (i32, i32) {
    %c0_i32 = arith.constant 0 : i32
    %c0_i32_0 = arith.constant 0 : i32
    %c0_i32_1 = arith.constant 0 : i32
    return %c0_i32, %c0_i32_0 : i32, i32
  }
  func.func @transform_2(%arg0: i32) -> (i32, i32) {
    %c0_i32 = arith.constant 0 : i32
    %c0_i32_0 = arith.constant 0 : i32
    %c0_i32_1 = arith.constant 0 : i32
    return %c0_i32, %c0_i32_0 : i32, i32
  }
}

module attributes {stable_mosaic.version = 11 : i64} {
  func.func @_compgcn_layer_kernel(%arg0: i32, %arg1: memref<16x128xf32, #tpu.memory_space<vmem>>, %arg2: memref<8x128xf32, #tpu.memory_space<vmem>>, %arg3: memref<16x1xi32, #tpu.memory_space<vmem>>, %arg4: memref<16x1xi32, #tpu.memory_space<vmem>>, %arg5: memref<1x16xi32, #tpu.memory_space<vmem>>, %arg6: memref<1x16xf32, #tpu.memory_space<vmem>>, %arg7: memref<16x1xi32, #tpu.memory_space<vmem>>, %arg8: memref<16x1xi32, #tpu.memory_space<vmem>>, %arg9: memref<1x16xi32, #tpu.memory_space<vmem>>, %arg10: memref<1x16xf32, #tpu.memory_space<vmem>>, %arg11: memref<128x128xf32, #tpu.memory_space<vmem>>, %arg12: memref<128x128xf32, #tpu.memory_space<vmem>>, %arg13: memref<128x128xf32, #tpu.memory_space<vmem>>, %arg14: memref<128x128xf32, #tpu.memory_space<vmem>>, %arg15: memref<1x128xf32, #tpu.memory_space<vmem>>, %arg16: memref<1x128xf32, #tpu.memory_space<vmem>>, %arg17: memref<1x128xf32, #tpu.memory_space<vmem>>, %arg18: memref<16x128xf32, #tpu.memory_space<vmem>>, %arg19: memref<8x128xf32, #tpu.memory_space<vmem>>) attributes {dimension_semantics = [#tpu.dimension_semantics<arbitrary>], iteration_bounds = array<i64: 1>, scalar_prefetch = 0 : i64, scratch_operands = 0 : i64, tpu.core_type = #tpu.core_type<tc>, window_params = [{pipeline_mode = #tpu.pipeline_mode<synchronous>, transform_indices = @transform_0, window_bounds = array<i64: 16, 128>}, {pipeline_mode = #tpu.pipeline_mode<synchronous>, transform_indices = @transform_1, window_bounds = array<i64: 8, 128>}, {pipeline_mode = #tpu.pipeline_mode<synchronous>, transform_indices = @transform_2, window_bounds = array<i64: 16, 1>}, {pipeline_mode = #tpu.pipeline_mode<synchronous>, transform_indices = @transform_3, window_bounds = array<i64: 16, 1>}, {pipeline_mode = #tpu.pipeline_mode<synchronous>, transform_indices = @transform_4, window_bounds = array<i64: 1, 16>}, {pipeline_mode = #tpu.pipeline_mode<synchronous>, transform_indices = @transform_5, window_bounds = array<i64: 1, 16>}, {pipeline_mode = #tpu.pipeline_mode<synchronous>, transform_indices = @transform_6, window_bounds = array<i64: 16, 1>}, {pipeline_mode = #tpu.pipeline_mode<synchronous>, transform_indices = @transform_7, window_bounds = array<i64: 16, 1>}, {pipeline_mode = #tpu.pipeline_mode<synchronous>, transform_indices = @transform_8, window_bounds = array<i64: 1, 16>}, {pipeline_mode = #tpu.pipeline_mode<synchronous>, transform_indices = @transform_9, window_bounds = array<i64: 1, 16>}, {pipeline_mode = #tpu.pipeline_mode<synchronous>, transform_indices = @transform_10, window_bounds = array<i64: 128, 128>}, {pipeline_mode = #tpu.pipeline_mode<synchronous>, transform_indices = @transform_11, window_bounds = array<i64: 128, 128>}, {pipeline_mode = #tpu.pipeline_mode<synchronous>, transform_indices = @transform_12, window_bounds = array<i64: 128, 128>}, {pipeline_mode = #tpu.pipeline_mode<synchronous>, transform_indices = @transform_13, window_bounds = array<i64: 128, 128>}, {pipeline_mode = #tpu.pipeline_mode<synchronous>, transform_indices = @transform_14, window_bounds = array<i64: 1, 128>}, {pipeline_mode = #tpu.pipeline_mode<synchronous>, transform_indices = @transform_15, window_bounds = array<i64: 1, 128>}, {pipeline_mode = #tpu.pipeline_mode<synchronous>, transform_indices = @transform_16, window_bounds = array<i64: 1, 128>}, {pipeline_mode = #tpu.pipeline_mode<synchronous>, transform_indices = @transform_17, window_bounds = array<i64: 16, 128>}, {pipeline_mode = #tpu.pipeline_mode<synchronous>, transform_indices = @transform_18, window_bounds = array<i64: 8, 128>}]} {
    %c0 = arith.constant 0 : index
    %c0_0 = arith.constant 0 : index
    %0 = vector.load %arg1[%c0, %c0_0] : memref<16x128xf32, #tpu.memory_space<vmem>>, vector<16x128xf32>
    %c0_1 = arith.constant 0 : index
    %c0_2 = arith.constant 0 : index
    %1 = vector.load %arg2[%c0_1, %c0_2] : memref<8x128xf32, #tpu.memory_space<vmem>>, vector<8x128xf32>
    %2 = tpu.iota {dimensions = array<i32: 1>} : vector<16x16xi32>
    %3 = tpu.iota {dimensions = array<i32: 1>} : vector<16x8xi32>
    %4 = tpu.iota {dimensions = array<i32: 0>} : vector<16x16xi32>
    %c0_3 = arith.constant 0 : index
    %c0_4 = arith.constant 0 : index
    %5 = vector.load %arg3[%c0_3, %c0_4] : memref<16x1xi32, #tpu.memory_space<vmem>>, vector<16x1xi32>
    %6 = vector.broadcast %5 : vector<16x1xi32> to vector<16x16xi32>
    %7 = arith.cmpi eq, %2, %6 : vector<16x16xi32>
    %8 = arith.extui %7 : vector<16x16xi1> to vector<16x16xi32>
    %9 = arith.sitofp %8 : vector<16x16xi32> to vector<16x16xf32>
    %cst = arith.constant dense<0.000000e+00> : vector<16x128xf32>
    %10 = tpu.matmul %9, %0, %cst {dimension_numbers = #tpu.dot_dimension_numbers<[1], [0], [0], [1], [0, 0, 1, 1], [], []>} : vector<16x16xf32>, vector<16x128xf32>, vector<16x128xf32> -> vector<16x128xf32>
    %c0_5 = arith.constant 0 : index
    %c0_6 = arith.constant 0 : index
    %11 = vector.load %arg4[%c0_5, %c0_6] : memref<16x1xi32, #tpu.memory_space<vmem>>, vector<16x1xi32>
    %12 = vector.broadcast %11 : vector<16x1xi32> to vector<16x8xi32>
    %13 = arith.cmpi eq, %3, %12 : vector<16x8xi32>
    %14 = arith.extui %13 : vector<16x8xi1> to vector<16x8xi32>
    %15 = arith.sitofp %14 : vector<16x8xi32> to vector<16x8xf32>
    %cst_7 = arith.constant dense<0.000000e+00> : vector<16x128xf32>
    %16 = tpu.matmul %15, %1, %cst_7 {dimension_numbers = #tpu.dot_dimension_numbers<[1], [0], [0], [1], [0, 0, 1, 1], [], []>} : vector<16x8xf32>, vector<8x128xf32>, vector<16x128xf32> -> vector<16x128xf32>
    %17 = arith.mulf %10, %16 : vector<16x128xf32>
    %c0_8 = arith.constant 0 : index
    %c0_9 = arith.constant 0 : index
    %18 = vector.load %arg11[%c0_8, %c0_9] : memref<128x128xf32, #tpu.memory_space<vmem>>, vector<128x128xf32>
    %cst_10 = arith.constant dense<0.000000e+00> : vector<16x128xf32>
    %19 = tpu.matmul %17, %18, %cst_10 {dimension_numbers = #tpu.dot_dimension_numbers<[1], [0], [0], [1], [0, 0, 1, 1], [], []>} : vector<16x128xf32>, vector<128x128xf32>, vector<16x128xf32> -> vector<16x128xf32>
    %c0_11 = arith.constant 0 : index
    %c0_12 = arith.constant 0 : index
    %20 = vector.load %arg5[%c0_11, %c0_12] : memref<1x16xi32, #tpu.memory_space<vmem>>, vector<1x16xi32>
    %21 = vector.broadcast %20 : vector<1x16xi32> to vector<16x16xi32>
    %22 = arith.cmpi eq, %4, %21 : vector<16x16xi32>
    %23 = arith.extui %22 : vector<16x16xi1> to vector<16x16xi32>
    %24 = arith.sitofp %23 : vector<16x16xi32> to vector<16x16xf32>
    %c0_13 = arith.constant 0 : index
    %c0_14 = arith.constant 0 : index
    %25 = vector.load %arg6[%c0_13, %c0_14] : memref<1x16xf32, #tpu.memory_space<vmem>>, vector<1x16xf32>
    %26 = vector.broadcast %25 : vector<1x16xf32> to vector<16x16xf32>
    %27 = arith.mulf %24, %26 : vector<16x16xf32>
    %cst_15 = arith.constant dense<0.000000e+00> : vector<16x128xf32>
    %28 = tpu.matmul %27, %19, %cst_15 {dimension_numbers = #tpu.dot_dimension_numbers<[1], [0], [0], [1], [0, 0, 1, 1], [], []>} : vector<16x16xf32>, vector<16x128xf32>, vector<16x128xf32> -> vector<16x128xf32>
    %c0_16 = arith.constant 0 : index
    %c0_17 = arith.constant 0 : index
    %29 = vector.load %arg7[%c0_16, %c0_17] : memref<16x1xi32, #tpu.memory_space<vmem>>, vector<16x1xi32>
    %30 = vector.broadcast %29 : vector<16x1xi32> to vector<16x16xi32>
    %31 = arith.cmpi eq, %2, %30 : vector<16x16xi32>
    %32 = arith.extui %31 : vector<16x16xi1> to vector<16x16xi32>
    %33 = arith.sitofp %32 : vector<16x16xi32> to vector<16x16xf32>
    %cst_18 = arith.constant dense<0.000000e+00> : vector<16x128xf32>
    %34 = tpu.matmul %33, %0, %cst_18 {dimension_numbers = #tpu.dot_dimension_numbers<[1], [0], [0], [1], [0, 0, 1, 1], [], []>} : vector<16x16xf32>, vector<16x128xf32>, vector<16x128xf32> -> vector<16x128xf32>
    %c0_19 = arith.constant 0 : index
    %c0_20 = arith.constant 0 : index
    %35 = vector.load %arg8[%c0_19, %c0_20] : memref<16x1xi32, #tpu.memory_space<vmem>>, vector<16x1xi32>
    %36 = vector.broadcast %35 : vector<16x1xi32> to vector<16x8xi32>
    %37 = arith.cmpi eq, %3, %36 : vector<16x8xi32>
    %38 = arith.extui %37 : vector<16x8xi1> to vector<16x8xi32>
    %39 = arith.sitofp %38 : vector<16x8xi32> to vector<16x8xf32>
    %cst_21 = arith.constant dense<0.000000e+00> : vector<16x128xf32>
    %40 = tpu.matmul %39, %1, %cst_21 {dimension_numbers = #tpu.dot_dimension_numbers<[1], [0], [0], [1], [0, 0, 1, 1], [], []>} : vector<16x8xf32>, vector<8x128xf32>, vector<16x128xf32> -> vector<16x128xf32>
    %41 = arith.mulf %34, %40 : vector<16x128xf32>
    %c0_22 = arith.constant 0 : index
    %c0_23 = arith.constant 0 : index
    %42 = vector.load %arg12[%c0_22, %c0_23] : memref<128x128xf32, #tpu.memory_space<vmem>>, vector<128x128xf32>
    %cst_24 = arith.constant dense<0.000000e+00> : vector<16x128xf32>
    %43 = tpu.matmul %41, %42, %cst_24 {dimension_numbers = #tpu.dot_dimension_numbers<[1], [0], [0], [1], [0, 0, 1, 1], [], []>} : vector<16x128xf32>, vector<128x128xf32>, vector<16x128xf32> -> vector<16x128xf32>
    %c0_25 = arith.constant 0 : index
    %c0_26 = arith.constant 0 : index
    %44 = vector.load %arg9[%c0_25, %c0_26] : memref<1x16xi32, #tpu.memory_space<vmem>>, vector<1x16xi32>
    %45 = vector.broadcast %44 : vector<1x16xi32> to vector<16x16xi32>
    %46 = arith.cmpi eq, %4, %45 : vector<16x16xi32>
    %47 = arith.extui %46 : vector<16x16xi1> to vector<16x16xi32>
    %48 = arith.sitofp %47 : vector<16x16xi32> to vector<16x16xf32>
    %c0_27 = arith.constant 0 : index
    %c0_28 = arith.constant 0 : index
    %49 = vector.load %arg10[%c0_27, %c0_28] : memref<1x16xf32, #tpu.memory_space<vmem>>, vector<1x16xf32>
    %50 = vector.broadcast %49 : vector<1x16xf32> to vector<16x16xf32>
    %51 = arith.mulf %48, %50 : vector<16x16xf32>
    %cst_29 = arith.constant dense<0.000000e+00> : vector<16x128xf32>
    %52 = tpu.matmul %51, %43, %cst_29 {dimension_numbers = #tpu.dot_dimension_numbers<[1], [0], [0], [1], [0, 0, 1, 1], [], []>} : vector<16x16xf32>, vector<16x128xf32>, vector<16x128xf32> -> vector<16x128xf32>
    %53 = arith.addf %28, %52 : vector<16x128xf32>
    %c0_30 = arith.constant 0 : index
    %c0_31 = arith.constant 0 : index
    %54 = vector.load %arg15[%c0_30, %c0_31] : memref<1x128xf32, #tpu.memory_space<vmem>>, vector<1x128xf32>
    %55 = vector.broadcast %54 : vector<1x128xf32> to vector<16x128xf32>
    %56 = arith.mulf %0, %55 : vector<16x128xf32>
    %c0_32 = arith.constant 0 : index
    %c0_33 = arith.constant 0 : index
    %57 = vector.load %arg13[%c0_32, %c0_33] : memref<128x128xf32, #tpu.memory_space<vmem>>, vector<128x128xf32>
    %cst_34 = arith.constant dense<0.000000e+00> : vector<16x128xf32>
    %58 = tpu.matmul %56, %57, %cst_34 {dimension_numbers = #tpu.dot_dimension_numbers<[1], [0], [0], [1], [0, 0, 1, 1], [], []>} : vector<16x128xf32>, vector<128x128xf32>, vector<16x128xf32> -> vector<16x128xf32>
    %59 = arith.addf %53, %58 : vector<16x128xf32>
    %cst_35 = arith.constant 0.333333343 : f32
    %60 = vector.broadcast %cst_35 : f32 to vector<16x128xf32>
    %61 = arith.mulf %59, %60 : vector<16x128xf32>
    %c0_36 = arith.constant 0 : index
    %c0_37 = arith.constant 0 : index
    %62 = vector.load %arg16[%c0_36, %c0_37] : memref<1x128xf32, #tpu.memory_space<vmem>>, vector<1x128xf32>
    %63 = vector.broadcast %62 : vector<1x128xf32> to vector<16x128xf32>
    %64 = arith.mulf %61, %63 : vector<16x128xf32>
    %c0_38 = arith.constant 0 : index
    %c0_39 = arith.constant 0 : index
    %65 = vector.load %arg17[%c0_38, %c0_39] : memref<1x128xf32, #tpu.memory_space<vmem>>, vector<1x128xf32>
    %66 = vector.broadcast %65 : vector<1x128xf32> to vector<16x128xf32>
    %67 = arith.addf %64, %66 : vector<16x128xf32>
    %c0_40 = arith.constant 0 : index
    %c0_41 = arith.constant 0 : index
    %68 = vector.load %arg18[%c0_40, %c0_41] : memref<16x128xf32, #tpu.memory_space<vmem>>, vector<16x128xf32>
    tpu.vector_store %arg18[%c0_40, %c0_41], %67 {strides = array<i32>} : memref<16x128xf32, #tpu.memory_space<vmem>>, vector<16x128xf32>,
    %c0_42 = arith.constant 0 : index
    %c0_43 = arith.constant 0 : index
    %69 = vector.load %arg14[%c0_42, %c0_43] : memref<128x128xf32, #tpu.memory_space<vmem>>, vector<128x128xf32>
    %cst_44 = arith.constant dense<0.000000e+00> : vector<8x128xf32>
    %70 = tpu.matmul %1, %69, %cst_44 {dimension_numbers = #tpu.dot_dimension_numbers<[1], [0], [0], [1], [0, 0, 1, 1], [], []>} : vector<8x128xf32>, vector<128x128xf32>, vector<8x128xf32> -> vector<8x128xf32>
    %c0_45 = arith.constant 0 : index
    %c0_46 = arith.constant 0 : index
    %71 = vector.load %arg19[%c0_45, %c0_46] : memref<8x128xf32, #tpu.memory_space<vmem>>, vector<8x128xf32>
    tpu.vector_store %arg19[%c0_45, %c0_46], %70 {strides = array<i32>} : memref<8x128xf32, #tpu.memory_space<vmem>>, vector<8x128xf32>,
    return
  }
  func.func @transform_0(%arg0: i32) -> (i32, i32) {
    %c0_i32 = arith.constant 0 : i32
    %c0_i32_0 = arith.constant 0 : i32
    %c0_i32_1 = arith.constant 0 : i32
    return %c0_i32, %c0_i32_0 : i32, i32
  }
  func.func @transform_1(%arg0: i32) -> (i32, i32) {
    %c0_i32 = arith.constant 0 : i32
    %c0_i32_0 = arith.constant 0 : i32
    %c0_i32_1 = arith.constant 0 : i32
    return %c0_i32, %c0_i32_0 : i32, i32
  }
  func.func @transform_2(%arg0: i32) -> (i32, i32) {
    %c0_i32 = arith.constant 0 : i32
    %c0_i32_0 = arith.constant 0 : i32
    %c0_i32_1 = arith.constant 0 : i32
    return %c0_i32, %c0_i32_0 : i32, i32
  }
  func.func @transform_3(%arg0: i32) -> (i32, i32) {
    %c0_i32 = arith.constant 0 : i32
    %c0_i32_0 = arith.constant 0 : i32
    %c0_i32_1 = arith.constant 0 : i32
    return %c0_i32, %c0_i32_0 : i32, i32
  }
  func.func @transform_4(%arg0: i32) -> (i32, i32) {
    %c0_i32 = arith.constant 0 : i32
    %c0_i32_0 = arith.constant 0 : i32
    %c0_i32_1 = arith.constant 0 : i32
    return %c0_i32, %c0_i32_0 : i32, i32
  }
  func.func @transform_5(%arg0: i32) -> (i32, i32) {
    %c0_i32 = arith.constant 0 : i32
    %c0_i32_0 = arith.constant 0 : i32
    %c0_i32_1 = arith.constant 0 : i32
    return %c0_i32, %c0_i32_0 : i32, i32
  }
  func.func @transform_6(%arg0: i32) -> (i32, i32) {
    %c0_i32 = arith.constant 0 : i32
    %c0_i32_0 = arith.constant 0 : i32
    %c0_i32_1 = arith.constant 0 : i32
    return %c0_i32, %c0_i32_0 : i32, i32
  }
  func.func @transform_7(%arg0: i32) -> (i32, i32) {
    %c0_i32 = arith.constant 0 : i32
    %c0_i32_0 = arith.constant 0 : i32
    %c0_i32_1 = arith.constant 0 : i32
    return %c0_i32, %c0_i32_0 : i32, i32
  }
  func.func @transform_8(%arg0: i32) -> (i32, i32) {
    %c0_i32 = arith.constant 0 : i32
    %c0_i32_0 = arith.constant 0 : i32
    %c0_i32_1 = arith.constant 0 : i32
    return %c0_i32, %c0_i32_0 : i32, i32
  }
  func.func @transform_9(%arg0: i32) -> (i32, i32) {
    %c0_i32 = arith.constant 0 : i32
    %c0_i32_0 = arith.constant 0 : i32
    %c0_i32_1 = arith.constant 0 : i32
    return %c0_i32, %c0_i32_0 : i32, i32
  }
  func.func @transform_10(%arg0: i32) -> (i32, i32) {
    %c0_i32 = arith.constant 0 : i32
    %c0_i32_0 = arith.constant 0 : i32
    %c0_i32_1 = arith.constant 0 : i32
    return %c0_i32, %c0_i32_0 : i32, i32
  }
  func.func @transform_11(%arg0: i32) -> (i32, i32) {
    %c0_i32 = arith.constant 0 : i32
    %c0_i32_0 = arith.constant 0 : i32
    %c0_i32_1 = arith.constant 0 : i32
    return %c0_i32, %c0_i32_0 : i32, i32
  }
  func.func @transform_12(%arg0: i32) -> (i32, i32) {
    %c0_i32 = arith.constant 0 : i32
    %c0_i32_0 = arith.constant 0 : i32
    %c0_i32_1 = arith.constant 0 : i32
    return %c0_i32, %c0_i32_0 : i32, i32
  }
  func.func @transform_13(%arg0: i32) -> (i32, i32) {
    %c0_i32 = arith.constant 0 : i32
    %c0_i32_0 = arith.constant 0 : i32
    %c0_i32_1 = arith.constant 0 : i32
    return %c0_i32, %c0_i32_0 : i32, i32
  }
  func.func @transform_14(%arg0: i32) -> (i32, i32) {
    %c0_i32 = arith.constant 0 : i32
    %c0_i32_0 = arith.constant 0 : i32
    %c0_i32_1 = arith.constant 0 : i32
    return %c0_i32, %c0_i32_0 : i32, i32
  }
  func.func @transform_15(%arg0: i32) -> (i32, i32) {
    %c0_i32 = arith.constant 0 : i32
    %c0_i32_0 = arith.constant 0 : i32
    %c0_i32_1 = arith.constant 0 : i32
    return %c0_i32, %c0_i32_0 : i32, i32
  }
  func.func @transform_16(%arg0: i32) -> (i32, i32) {
    %c0_i32 = arith.constant 0 : i32
    %c0_i32_0 = arith.constant 0 : i32
    %c0_i32_1 = arith.constant 0 : i32
    return %c0_i32, %c0_i32_0 : i32, i32
  }
  func.func @transform_17(%arg0: i32) -> (i32, i32) {
    %c0_i32 = arith.constant 0 : i32
    %c0_i32_0 = arith.constant 0 : i32
    %c0_i32_1 = arith.constant 0 : i32
    return %c0_i32, %c0_i32_0 : i32, i32
  }
  func.func @transform_18(%arg0: i32) -> (i32, i32) {
    %c0_i32 = arith.constant 0 : i32
    %c0_i32_0 = arith.constant 0 : i32
    %c0_i32_1 = arith.constant 0 : i32
    return %c0_i32, %c0_i32_0 : i32, i32
  }
}

</mosaic_0001>

<bundles_post_ra>
// kernel: kggcn_forward.7
= control target key start
LH: loop header
LB: loop body
LE: loop exit
PB: predicated region body
PF: predicated region fallthrough
CT: control target
= control target key end

     0   :  { %v147_v2 = vmov 0   ;;  %v148_v3 = vmov 0.0   ;;  %s175_s0 = inlined_call_operand.vmem [shape: s32[2,1], index: 0, kind: input, shape index: {}]   ;;  %s176_s1 = inlined_call_operand.vmem [shape: f32[8,128], index: 1, kind: input, shape index: {}]   ;;  %s177_s2 = inlined_call_operand.hbm [shape: f32[2,128], index: 2, kind: output, shape index: {}]  }
   0x1   :  { %v14_v0 = vld [vmem:[%s175_s0] sm:$0x3]  ;;  %124 = vset.pattern.permute.xlu0 %v147_v2  ;;  %115 = vmatprep.subr.mxu0 %v148_v3 }
   0x2   :  { %v21_v1 = vld [vmem:[%s176_s1] sm:$0xff] }
   0x3   :  { %7 = vsyncpa [#allocation3], 0  ;;  %16 = vperm.xlu0 %124, %v14_v0   ;;  %116 = vmatpush3.msra.mxu0 %v21_v1  ;;  %vm149_vm0 = vmmov 0   ;;  %v12_v4 = vlaneseq  ;;  %vm22_vm1 = vcmask 64512   ;;  %s150_s0 = smov [#allocation2]  }
   0x4   :  { %117 = vmatprep.mubr.msk.f32.mxu0 %vm149_vm0, %v148_v3  ;;  %s103_s13 = sshll.u32 %s150_s0, 4  ;;  %s104_s13 = int_to_ptr.vmem [resolvable:$true] %s103_s13 }
   0x5   :  { %v13_v5 = vand.u32 127, %v12_v4  ;;  %s125_s1 = scalar_lea.vmem %s104_s13, 32  ;;  %p130_p1 = scmp.lt.s32.totalorder %s104_s13, %s104_s13 }
   0x6   :  { %p126_p0 = scmp.ne.s32.totalorder %s104_s13, %s125_s1  ;;  %p131_p2 = scmp.lt.s32.totalorder %s125_s1, %s125_s1 }
   0x8   :  { %p132_p3 = por %p131_p2, %p130_p1 }
   0xa   :  { %p133_p4 = pnand %p132_p3, %p126_p0 }
  0x7e   :  { %v17_v6 = vpop.permute.xlu0 %16 }
  0x7f   :  { %vm18_vm2 = vcmp.eq.s32.totalorder %v13_v5, %v17_v6 }
  0x80   :  { %v111_v7 = vsel %vm18_vm2, 1.0, %v148_v3 }
  0x81   :  { %118 = vmatmul.mubr.msk.f32.vlgmr.msra.gmra.mxu0 %vm22_vm1, %v111_v7 }
 0x141   :  { %v92_v8 = vpop.f32.mrf.mxu0 }
 0x142   :  { %96 = vst [vmem:[#allocation2] sm:$0x3] %v92_v8 }
 0x143   :  { %v119_v9 = vpop.f32.mrf.mxu0 }
 0x144   :  { %136 = shalt.err (!%p133_p4)
}
 0x145   :  { %106 = dma.vmem_to_hbm [thread:$0]  %s104_s13, 32, %s177_s2, [#allocation3]  }
 0x146   :  { %145 = dma.done.wait [#allocation3], 32  }
 0x147   :  { %146 = vsyncadd [#allocation3], 4294967264 }
 0x148   :  { %110 = vsyncpa [#allocation3], 1 }

// kernel: kggcn_forward.6
= control target key start
LH: loop header
LB: loop body
LE: loop exit
PB: predicated region body
PF: predicated region fallthrough
CT: control target
= control target key end

     0   :  { %v151_v2 = vmov 0   ;;  %v152_v3 = vmov 0.0   ;;  %s182_s0 = inlined_call_operand.vmem [shape: s32[2,1], index: 0, kind: input, shape index: {}]   ;;  %s183_s1 = inlined_call_operand.vmem [shape: f32[16,128], index: 1, kind: input, shape index: {}]   ;;  %s184_s2 = inlined_call_operand.hbm [shape: f32[2,128], index: 2, kind: output, shape index: {}]  }
   0x1   :  { %v14_v0 = vld [vmem:[%s182_s0] sm:$0x3]  ;;  %v22_v1 = vld [vmem:[%s183_s1 + $0x8] sm:$0xff]  ;;  %128 = vset.pattern.permute.xlu0 %v151_v2  ;;  %117 = vmatprep.subr.mxu0 %v152_v3 }
   0x2   :  { %v21_v4 = vld [vmem:[%s183_s1] sm:$0xff] }
   0x3   :  { %7 = vsyncpa [#allocation3], 0  ;;  %16 = vperm.xlu0 %128, %v14_v0   ;;  %118 = vmatpush3.msra.mxu0 %v22_v1  ;;  %vm153_vm0 = vmmov 0   ;;  %v12_v5 = vlaneseq  ;;  %vm23_vm1 = vcmask 130048   ;;  %s154_s0 = smov [#allocation2]  }
   0x4   :  { %119 = vmatprep.subr.mxu0 %v152_v3  ;;  %121 = vmatprep.mubr.msk.f32.mxu0 %vm153_vm0, %v152_v3  ;;  %s104_s15 = sshll.u32 %s154_s0, 4  ;;  %s105_s15 = int_to_ptr.vmem [resolvable:$true] %s104_s15 }
   0x5   :  { %120 = vmatpush3.msra.mxu0 %v21_v4  ;;  %v13_v6 = vand.u32 127, %v12_v5  ;;  %s129_s1 = scalar_lea.vmem %s105_s15, 32  ;;  %p134_p1 = scmp.lt.s32.totalorder %s105_s15, %s105_s15 }
   0x6   :  { %p130_p0 = scmp.ne.s32.totalorder %s105_s15, %s129_s1  ;;  %p135_p2 = scmp.lt.s32.totalorder %s129_s1, %s129_s1 }
   0x8   :  { %p136_p3 = por %p135_p2, %p134_p1 }
   0xa   :  { %p137_p4 = pnand %p136_p3, %p130_p0 }
  0x7e   :  { %v17_v7 = vpop.permute.xlu0 %16 }
  0x7f   :  { %vm18_vm2 = vcmp.eq.s32.totalorder %v13_v6, %v17_v7 }
  0x80   :  { %v112_v8 = vsel %vm18_vm2, 1.0, %v152_v3 }
  0x81   :  { %122 = vmatmul.mubr.msk.f32.vlgmr.msra.gmra.mxu0 %vm23_vm1, %v112_v8 }
 0x141   :  { %v93_v9 = vpop.f32.mrf.mxu0 }
 0x142   :  { %97 = vst [vmem:[#allocation2] sm:$0x3] %v93_v9 }
 0x143   :  { %v123_v10 = vpop.f32.mrf.mxu0 }
 0x144   :  { %140 = shalt.err (!%p137_p4)
}
 0x145   :  { %107 = dma.vmem_to_hbm [thread:$0]  %s105_s15, 32, %s184_s2, [#allocation3]  }
 0x146   :  { %149 = dma.done.wait [#allocation3], 32  }
 0x147   :  { %150 = vsyncadd [#allocation3], 4294967264 }
 0x148   :  { %111 = vsyncpa [#allocation3], 1 }

// kernel: kggcn_forward.4
= control target key start
LH: loop header
LB: loop body
LE: loop exit
PB: predicated region body
PF: predicated region fallthrough
CT: control target
= control target key end

     0   :  { %s1854_s0 = inlined_call_operand.hbm [shape: f32[16,128], index: 0, kind: input, shape index: {}]   ;;  %s1855_s1 = inlined_call_operand.vmem [shape: f32[8,128], index: 1, kind: input, shape index: {}]   ;;  %s1856_s2 = inlined_call_operand.vmem [shape: s32[16,1], index: 2, kind: input, shape index: {}]   ;;  %s1857_s3 = inlined_call_operand.vmem [shape: s32[16,1], index: 3, kind: input, shape index: {}]   ;;  %s1858_s4 = inlined_call_operand.vmem [shape: s32[1,16], index: 4, kind: input, shape index: {}]   ;;  %s1859_s5 = inlined_call_operand.vmem [shape: f32[1,16], index: 5, kind: input, shape index: {}]   ;;  %s1860_s6 = inlined_call_operand.vmem [shape: s32[16,1], index: 6, kind: input, shape index: {}]   ;;  %s1861_s7 = inlined_call_operand.vmem [shape: s32[16,1], index: 7, kind: input, shape index: {}]   ;;  %s1862_s8 = inlined_call_operand.vmem [shape: s32[1,16], index: 8, kind: input, shape index: {}]   ;;  %s1863_s9 = inlined_call_operand.vmem [shape: f32[1,16], index: 9, kind: input, shape index: {}]   ;;  %s1864_s10 = inlined_call_operand.vmem [shape: f32[128,128], index: 10, kind: input, shape index: {}]   ;;  %s1865_s11 = inlined_call_operand.hbm [shape: f32[128,128], index: 11, kind: input, shape index: {}]   ;;  %s1866_s12 = inlined_call_operand.hbm [shape: f32[128,128], index: 12, kind: input, shape index: {}]   ;;  %s1867_s13 = inlined_call_operand.hbm [shape: f32[128,128], index: 13, kind: input, shape index: {}]   ;;  %s1868_s14 = inlined_call_operand.hbm [shape: f32[1,128], index: 14, kind: input, shape index: {}]   ;;  %s1869_s15 = inlined_call_operand.vmem [shape: f32[1,128], index: 15, kind: input, shape index: {}]   ;;  %s1870_s16 = inlined_call_operand.vmem [shape: f32[1,128], index: 16, kind: input, shape index: {}]   ;;  %s1871_s17 = inlined_call_operand.vmem [shape: f32[16,128], index: 17, kind: output, shape index: {0}]   ;;  %s1872_s18 = inlined_call_operand.vmem [shape: f32[8,128], index: 18, kind: output, shape index: {1}]  }
   0x1   :  { %1874 = sst [smem:[#allocation13_spill]] %s1854_s0 }
   0x2   :  { %1875 = sst [smem:[#allocation14_spill]] %s1855_s1 }
   0x3   :  { %1876 = sst [smem:[#allocation15_spill]] %s1856_s2 }
   0x4   :  { %24 = vsyncpa [#allocation3], 0 }
   0x5   :  { %25 = vsyncpa [#allocation5], 0 }
   0x6   :  { %26 = vsyncpa [#allocation8], 0  ;;  %s1544_s27 = smov [#allocation4]   ;;  %s1545_s29 = smov [#allocation7]  }
   0x7   :  { %s64_s28 = sshll.u32 %s1544_s27, 4  ;;  %s88_s30 = sshll.u32 %s1545_s29, 4  ;;  %s65_s28 = int_to_ptr.vmem [resolvable:$true] %s64_s28  ;;  %s89_s30 = int_to_ptr.vmem [resolvable:$true] %s88_s30 }
   0x8   :  { %s1446_s0 = scalar_lea.vmem %s65_s28, 2048  ;;  %p1451_p1 = scmp.lt.s32.totalorder %s65_s28, %s65_s28 }
   0x9   :  { %p1447_p0 = scmp.ne.s32.totalorder %s65_s28, %s1446_s0  ;;  %p1452_p2 = scmp.lt.s32.totalorder %s1446_s0, %s1446_s0 }
   0xb   :  { %p1453_p3 = por %p1452_p2, %p1451_p1 }
   0xd   :  { %p1454_p4 = pnand %p1453_p3, %p1447_p0 }
   0xf   :  { %1457 = shalt.err (!%p1454_p4)
}
  0x10   :  { %s1546_s19 = smov 128   ;;  %s1547_s1 = smov 8  }
  0x11   :  { %70 = dma.hbm_to_vmem [thread:$0]  %s1865_s11, 2048, %s65_s28, [#allocation5], %s1546_s19, %s1546_s19, %s1547_s1  }
  0x12   :  { %s1466_s22 = scalar_lea.vmem %s89_s30, 2048  ;;  %p1471_p6 = scmp.lt.s32.totalorder %s89_s30, %s89_s30 }
  0x13   :  { %p1467_p5 = scmp.ne.s32.totalorder %s89_s30, %s1466_s22  ;;  %p1472_p7 = scmp.lt.s32.totalorder %s1466_s22, %s1466_s22 }
  0x15   :  { %p1473_p8 = por %p1472_p7, %p1471_p6 }
  0x17   :  { %p1474_p9 = pnand %p1473_p8, %p1467_p5 }
  0x19   :  { %1477 = shalt.err (!%p1474_p9)
}
  0x1a   :  { %94 = dma.hbm_to_vmem [thread:$0]  %s1867_s13, 2048, %s89_s30, [#allocation8], %s1546_s19, %s1546_s19, %s1547_s1  }
  0x1b   :  { %s1548_s24 = smov [#allocation2]   ;;  %s1549_s26 = smov [#allocation6]  }
  0x1c   :  { %s32_s25 = sshll.u32 %s1548_s24, 4  ;;  %s76_s27 = sshll.u32 %s1549_s26, 4  ;;  %s33_s25 = int_to_ptr.vmem [resolvable:$true] %s32_s25  ;;  %s77_s27 = int_to_ptr.vmem [resolvable:$true] %s76_s27 }
  0x1d   :  { %s1486_s11 = scalar_lea.vmem %s33_s25, 256  ;;  %p1491_p11 = scmp.lt.s32.totalorder %s33_s25, %s33_s25 }
  0x1e   :  { %p1487_p10 = scmp.ne.s32.totalorder %s33_s25, %s1486_s11  ;;  %p1492_p12 = scmp.lt.s32.totalorder %s1486_s11, %s1486_s11 }
  0x20   :  { %p1493_p13 = por %p1492_p12, %p1491_p11 }
  0x22   :  { %p1494_p0 = pnand %p1493_p13, %p1487_p10 }
  0x24   :  { %1497 = shalt.err (!%p1494_p0)
}
  0x25   :  { %s1877_s0 = sld [smem:[#allocation13_spill]]  ;;  %s1506_s13 = scalar_lea.vmem %s77_s27, 2048 }
  0x26   :  { %p1507_p1 = scmp.ne.s32.totalorder %s77_s27, %s1506_s13  ;;  %p1511_p2 = scmp.lt.s32.totalorder %s77_s27, %s77_s27 }
  0x27   :  { %p1512_p3 = scmp.lt.s32.totalorder %s1506_s13, %s1506_s13 }
  0x29   :  { %p1513_p4 = por %p1512_p3, %p1511_p2 }
  0x2b   :  { %38 = dma.hbm_to_vmem [thread:$0]  %s1877_s0, 256, %s33_s25, [#allocation3], %s1546_s19, %s1546_s19, %s1547_s1  }
  0x2c   :  { %p1514_p5 = pnand %p1513_p4, %p1507_p1 }
  0x2e   :  { %1517 = shalt.err (!%p1514_p5)
}
  0x2f   :  { %82 = dma.hbm_to_vmem [thread:$0]  %s1866_s12, 2048, %s77_s27, [#allocation5], %s1546_s19, %s1546_s19, %s1547_s1  }
  0x30   :  { %s1550_s21 = smov [#allocation9]  }
  0x31   :  { %s101_s22 = sshll.u32 %s1550_s21, 4  ;;  %s102_s22 = int_to_ptr.vmem [resolvable:$true] %s101_s22 }
  0x32   :  { %s1526_s2 = scalar_lea.vmem %s102_s22, 16  ;;  %s1530_s23 = scalar_lea.vmem %s102_s22, 32 }
  0x33   :  { %p1527_p6 = scmp.ne.s32.totalorder %s102_s22, %s1526_s2  ;;  %p1531_p7 = scmp.lt.s32.totalorder %s102_s22, %s102_s22 }
  0x34   :  { %p1532_p8 = scmp.lt.s32.totalorder %s1530_s23, %s1526_s2 }
  0x36   :  { %p1533_p9 = por %p1532_p8, %p1531_p7 }
  0x38   :  { %p1534_p10 = pnand %p1533_p9, %p1527_p6 }
  0x3a   :  { %1537 = shalt.err (!%p1534_p10)
}
  0x3b   :  { %104 = dma.hbm_to_vmem [thread:$0]  %s1868_s14, 16, %s102_s22, [#allocation8]  }
  0x3c   :  { %1538 = dma.done.wait [#allocation3], 256  }
  0x3d   :  { %1539 = vsyncadd [#allocation3], 4294967040 }
  0x3e   :  { %1540 = dma.done.wait [#allocation5], 4096  }
  0x3f   :  { %1541 = vsyncadd [#allocation5], 4294963200 }
  0x40   :  { %1542 = dma.done.wait [#allocation8], 2064  }
  0x41   :  { %1543 = vsyncadd [#allocation8], 4294965232  ;;  %v1551_v0 = vmov 0   ;;  %v437_v1 = vld [vmem:[%s1860_s6] sm:$0xff]  ;;  %s1878_s27 = sld [smem:[#allocation15_spill]]  ;;  %v438_v3 = vld [vmem:[%s1860_s6 + $0x8] sm:$0xff]  ;;  %v127_v13 = vlaneseq }
  0x42   :  { %1437 = vset.pattern.permute.xlu1 %v1551_v0  ;;  %1436 = vset.pattern.permute.xlu0 %v1551_v0  ;;  %v1688_v5 = vld [vmem:[#allocation2 + $0x8] sm:$0xff]  ;;  %v1691_v6 = vld [vmem:[#allocation2] sm:$0xff]  ;;  %s1879_s22 = sld [smem:[#allocation14_spill]]  ;;  %v341_v12 = vld [vmem:[%s1864_s10 + $0x78] sm:$0xff]  ;;  %vm146_vm0 = vcmask 130048   ;;  %v1552_v17 = vmov 0.0  }
  0x43   :  { %440 = vperm.xlu1 %1437, %v437_v1   ;;  %1248 = vmatprep.subr.mxu0 %v1688_v5  ;;  %v533_v7 = vld [vmem:[%s1861_s7 + $0x8] sm:$0xff]  ;;  %v532_v8 = vld [vmem:[%s1861_s7] sm:$0xff]  ;;  %v128_v14 = vand.u32 127, %v127_v13  ;;  %vm242_vm6 = vcmask 64512   ;;  %v340_v34 = vld [vmem:[%s1864_s10 + $0x70] sm:$0xff]  ;;  %vm1553_vm12 = vmmov 0  }
  0x44   :  { %1249 = vmatpush3.msra.mxu0 %v1688_v5  ;;  %v229_v10 = vld [vmem:[%s1857_s3 + $0x8] sm:$0xff]  ;;  %v228_v11 = vld [vmem:[%s1857_s3] sm:$0xff]  ;;  %v642_v35 = vld [vmem:[#allocation4 + $0x68] sm:$0xff] }
  0x45   :  { %1250 = vmatprep.subr.mxu0 %v1691_v6  ;;  %v644_v27 = vld [vmem:[#allocation4 + $0x78] sm:$0xff]  ;;  %v643_v33 = vld [vmem:[#allocation4 + $0x70] sm:$0xff]  ;;  %v641_v37 = vld [vmem:[#allocation4 + $0x60] sm:$0xff] }
  0x46   :  { %1251 = vmatpush3.msra.mxu0 %v1691_v6  ;;  %v339_v36 = vld [vmem:[%s1864_s10 + $0x68] sm:$0xff]  ;;  %v338_v38 = vld [vmem:[%s1864_s10 + $0x60] sm:$0xff]  ;;  %v337_v40 = vld [vmem:[%s1864_s10 + $0x58] sm:$0xff] }
  0x47   :  { %v132_v2 = vld [vmem:[%s1878_s27] sm:$0xff]  ;;  %v133_v4 = vld [vmem:[%s1878_s27 + $0x8] sm:$0xff]  ;;  %443 = vperm.xlu1 %1437, %v438_v3   ;;  %1295 = vmatprep.subr.mxu0 %v1688_v5  ;;  %v336_v42 = vld [vmem:[%s1864_s10 + $0x50] sm:$0xff] }
  0x48   :  { %135 = vperm.xlu0 %1436, %v132_v2   ;;  %v1704_v9 = vld [vmem:[%s1879_s22] sm:$0xff]  ;;  %v640_v39 = vld [vmem:[#allocation4 + $0x58] sm:$0xff]  ;;  %v638_v43 = vld [vmem:[#allocation4 + $0x48] sm:$0xff] }
  0x49   :  { %1255 = vmatprep.subr.mxu1 %v1704_v9  ;;  %v639_v41 = vld [vmem:[#allocation4 + $0x50] sm:$0xff]  ;;  %v335_v44 = vld [vmem:[%s1864_s10 + $0x48] sm:$0xff]  ;;  %v637_v45 = vld [vmem:[#allocation4 + $0x40] sm:$0xff] }
  0x4a   :  { %1256 = vmatpush3.msra.mxu1 %v1704_v9  ;;  %v334_v46 = vld [vmem:[%s1864_s10 + $0x40] sm:$0xff]  ;;  %v636_v47 = vld [vmem:[#allocation4 + $0x38] sm:$0xff]  ;;  %v333_v48 = vld [vmem:[%s1864_s10 + $0x38] sm:$0xff] }
  0x4b   :  { %538 = vperm.xlu1 %1437, %v533_v7   ;;  %1260 = vmatprep.subr.mxu1 %v341_v12  ;;  %v635_v49 = vld [vmem:[#allocation4 + $0x30] sm:$0xff]  ;;  %v332_v50 = vld [vmem:[%s1864_s10 + $0x30] sm:$0xff]  ;;  %v634_v51 = vld [vmem:[#allocation4 + $0x28] sm:$0xff] }
  0x4c   :  { %138 = vperm.xlu0 %1436, %v133_v4   ;;  %v331_v52 = vld [vmem:[%s1864_s10 + $0x28] sm:$0xff]  ;;  %v633_v53 = vld [vmem:[#allocation4 + $0x20] sm:$0xff]  ;;  %v330_v54 = vld [vmem:[%s1864_s10 + $0x20] sm:$0xff] }
  0x4d   :  { %v632_v55 = vld [vmem:[#allocation4 + $0x18] sm:$0xff]  ;;  %v329_v56 = vld [vmem:[%s1864_s10 + $0x18] sm:$0xff]  ;;  %v631_v57 = vld [vmem:[#allocation4 + $0x10] sm:$0xff] }
  0x4e   :  { %v328_v58 = vld [vmem:[%s1864_s10 + $0x10] sm:$0xff]  ;;  %v630_v59 = vld [vmem:[#allocation4 + $0x8] sm:$0xff]  ;;  %v327_v60 = vld [vmem:[%s1864_s10 + $0x8] sm:$0xff] }
  0x4f   :  { %234 = vperm.xlu1 %1437, %v229_v10   ;;  %v629_v61 = vld [vmem:[#allocation4] sm:$0xff]  ;;  %v326_v62 = vld [vmem:[%s1864_s10] sm:$0xff] }
  0x50   :  { %535 = vperm.xlu0 %1436, %v532_v8  }
  0x54   :  { %231 = vperm.xlu0 %1436, %v228_v11  }
  0xbe   :  { %v441_v15 = vpop.permute.xlu1 %440 }
  0xbf   :  { %vm445_vm2 = vcmp.eq.s32.totalorder %v128_v14, %v441_v15  ;;  %v1788_v15 = vshrl.u32 %v127_v13, 7 }
  0xc0   :  { %v1136_v21 = vsel %vm445_vm2, 1.0, %v1552_v17 }
  0xc2   :  { %v444_v19 = vpop.permute.xlu1 %443 }
  0xc3   :  { %v136_v16 = vpop.permute.xlu0 %135  ;;  %vm446_vm4 = vcmp.eq.s32.totalorder %v128_v14, %v444_v19 }
  0xc4   :  { %vm140_vm1 = vcmp.eq.s32.totalorder %v128_v14, %v136_v16  ;;  %v1137_v25 = vsel %vm446_vm4, 1.0, %v1552_v17  ;;  %v1791_v16 = vadd.s32 8, %v1788_v15 }
  0xc5   :  { %v1124_v18 = vsel %vm140_vm1, 1.0, %v1552_v17 }
  0xc6   :  { %1252 = vmatprep.mubr.msk.f32.mxu0 %vm146_vm0, %v1124_v18  ;;  %v539_v23 = vpop.permute.xlu1 %538  ;;  %v1144_v18 = vld [vmem:[%s1862_s8] ss:$0 sm:$0xff] }
  0xc7   :  { %v139_v20 = vpop.permute.xlu0 %138  ;;  %vm541_vm7 = vcmp.eq.s32.totalorder %v128_v14, %v539_v23  ;;  %vm725_vm10 = vcmp.eq.s32.totalorder %v1788_v15, %v1144_v18  ;;  %vm726_vm11 = vcmp.eq.s32.totalorder %v1791_v16, %v1144_v18  ;;  %v1041_v23 = vld [vmem:[#allocation7 + $0x78] sm:$0xff] }
  0xc8   :  { %vm141_vm3 = vcmp.eq.s32.totalorder %v128_v14, %v139_v20  ;;  %v1141_v30 = vsel %vm541_vm7, 1.0, %v1552_v17  ;;  %v1145_v19 = vsel %vm725_vm10, 1.0, %v1552_v17  ;;  %v1147_v20 = vld [vmem:[%s1863_s9] ss:$0 sm:$0xff]  ;;  %v1146_v13 = vsel %vm726_vm11, 1.0, %v1552_v17 }
  0xc9   :  { %v1125_v22 = vsel %vm141_vm3, 1.0, %v1552_v17 }
  0xca   :  { %1253 = vmatmul.mubr.msk.f32.vlgmr.msra.gmra.mxu0 %vm146_vm0, %v1125_v22  ;;  %v235_v28 = vpop.permute.xlu1 %234  ;;  %v1803_v22 = vmul.f32 %v1147_v20, %v1146_v13 }
  0xcb   :  { %1296 = vmatpush3.msra.mxu0 %v1688_v5  ;;  %v536_v24 = vpop.permute.xlu0 %535  ;;  %1299 = vmatprep.mubr.msk.f32.mxu0 %vm146_vm0, %v1136_v21  ;;  %vm237_vm8 = vcmp.eq.s32.totalorder %v128_v14, %v235_v28  ;;  %v738_v21 = vmul.f32 %v1147_v20, %v1145_v19  ;;  %v1036_v28 = vld [vmem:[#allocation7 + $0x50] sm:$0xff] }
  0xcc   :  { %vm540_vm5 = vcmp.eq.s32.totalorder %v128_v14, %v536_v24  ;;  %1297 = vmatprep.subr.mxu0 %v1691_v6  ;;  %v1129_v31 = vsel %vm237_vm8, 1.0, %v1552_v17  ;;  %v1040_v24 = vld [vmem:[#allocation7 + $0x70] sm:$0xff] }
  0xcd   :  { %v1140_v26 = vsel %vm540_vm5, 1.0, %v1552_v17  ;;  %1298 = vmatpush3.msra.mxu0 %v1691_v6  ;;  %v1154_v19 = vld [vmem:[%s1870_s16] ss:$0 sm:$0xff] }
  0xce   :  { %1302 = vmatprep.subr.mxu0 %v1704_v9  ;;  %1300 = vmatmul.mubr.msk.f32.vlgmr.msra.gmra.mxu0 %vm146_vm0, %v1137_v25  ;;  %v1039_v25 = vld [vmem:[#allocation7 + $0x68] sm:$0xff] }
  0xcf   :  { %1303 = vmatpush3.msra.mxu0 %v1704_v9  ;;  %v232_v29 = vpop.permute.xlu0 %231  ;;  %1304 = vmatprep.mubr.msk.f32.mxu0 %vm242_vm6, %v1140_v26  ;;  %v1038_v26 = vld [vmem:[#allocation7 + $0x60] sm:$0xff] }
  0xd0   :  { %vm236_vm9 = vcmp.eq.s32.totalorder %v128_v14, %v232_v29  ;;  %1307 = vmatprep.subr.mxu0 %v644_v27  ;;  %v1035_v29 = vld [vmem:[#allocation7 + $0x48] sm:$0xff] }
  0xd1   :  { %v1128_v32 = vsel %vm236_vm9, 1.0, %v1552_v17 }
  0xd2   :  { %1257 = vmatprep.mubr.msk.f32.mxu1 %vm242_vm6, %v1128_v32  ;;  %1305 = vmatmul.mubr.msk.f32.vlgmr.msra.gmra.mxu0 %vm242_vm6, %v1141_v30  ;;  %v1034_v30 = vld [vmem:[#allocation7 + $0x40] sm:$0xff]  ;;  %v1032_v32 = vld [vmem:[#allocation7 + $0x30] sm:$0xff] }
  0xd3   :  { %1258 = vmatmul.mubr.msk.f32.vlgmr.msra.gmra.mxu1 %vm242_vm6, %v1129_v31  ;;  %1308 = vmatpush3.msra.mxu0 %v644_v27  ;;  %v1037_v27 = vld [vmem:[#allocation7 + $0x58] sm:$0xff] }
  0xd4   :  { %1261 = vmatpush3.msra.mxu1 %v341_v12  ;;  %1309 = vmatprep.subr.mxu0 %v643_v33  ;;  %v1033_v31 = vld [vmem:[#allocation7 + $0x38] sm:$0xff] }
  0xd5   :  { %1262 = vmatprep.subr.mxu1 %v340_v34  ;;  %1310 = vmatpush3.msra.mxu0 %v643_v33  ;;  %v1031_v33 = vld [vmem:[#allocation7 + $0x28] sm:$0xff] }
  0xd6   :  { %1263 = vmatpush3.msra.mxu1 %v340_v34  ;;  %1311 = vmatprep.subr.mxu0 %v642_v35  ;;  %v1030_v34 = vld [vmem:[#allocation7 + $0x20] sm:$0xff] }
  0xd7   :  { %1264 = vmatprep.subr.mxu1 %v339_v36  ;;  %1312 = vmatpush3.msra.mxu0 %v642_v35  ;;  %v1029_v35 = vld [vmem:[#allocation7 + $0x18] sm:$0xff] }
  0xd8   :  { %1265 = vmatpush3.msra.mxu1 %v339_v36  ;;  %1313 = vmatprep.subr.mxu0 %v641_v37  ;;  %v1028_v36 = vld [vmem:[#allocation7 + $0x10] sm:$0xff] }
  0xd9   :  { %1266 = vmatprep.subr.mxu1 %v338_v38  ;;  %1314 = vmatpush3.msra.mxu0 %v641_v37  ;;  %v1027_v37 = vld [vmem:[#allocation7 + $0x8] sm:$0xff] }
  0xda   :  { %1267 = vmatpush3.msra.mxu1 %v338_v38  ;;  %1315 = vmatprep.subr.mxu0 %v640_v39  ;;  %v1026_v38 = vld [vmem:[#allocation7] sm:$0xff] }
  0xdb   :  { %1268 = vmatprep.subr.mxu1 %v337_v40  ;;  %1316 = vmatpush3.msra.mxu0 %v640_v39  ;;  %v1132_v39 = vld [vmem:[%s1858_s4] ss:$0 sm:$0xff] }
  0xdc   :  { %1269 = vmatpush3.msra.mxu1 %v337_v40  ;;  %1317 = vmatprep.subr.mxu0 %v639_v41  ;;  %vm422_vm13 = vcmp.eq.s32.totalorder %v1788_v15, %v1132_v39  ;;  %vm423_vm14 = vcmp.eq.s32.totalorder %v1791_v16, %v1132_v39 }
  0xdd   :  { %1270 = vmatprep.subr.mxu1 %v336_v42  ;;  %1318 = vmatpush3.msra.mxu0 %v639_v41  ;;  %v1133_v40 = vsel %vm422_vm13, 1.0, %v1552_v17  ;;  %v1135_v41 = vld [vmem:[%s1859_s5] ss:$0 sm:$0xff] }
  0xde   :  { %1271 = vmatpush3.msra.mxu1 %v336_v42  ;;  %1319 = vmatprep.subr.mxu0 %v638_v43 }
  0xdf   :  { %1272 = vmatprep.subr.mxu1 %v335_v44  ;;  %1320 = vmatpush3.msra.mxu0 %v638_v43 }
  0xe0   :  { %1273 = vmatpush3.msra.mxu1 %v335_v44  ;;  %1321 = vmatprep.subr.mxu0 %v637_v45 }
  0xe1   :  { %1274 = vmatprep.subr.mxu1 %v334_v46  ;;  %1322 = vmatpush3.msra.mxu0 %v637_v45  ;;  %v435_v45 = vmul.f32 %v1135_v41, %v1133_v40 }
  0xe2   :  { %1275 = vmatpush3.msra.mxu1 %v334_v46  ;;  %1323 = vmatprep.subr.mxu0 %v636_v47  ;;  %v1152_v46 = vld [vmem:[#allocation9] ss:$0 sm:$0xff] }
  0xe3   :  { %1276 = vmatprep.subr.mxu1 %v333_v48  ;;  %1324 = vmatpush3.msra.mxu0 %v636_v47 }
  0xe4   :  { %1277 = vmatpush3.msra.mxu1 %v333_v48  ;;  %1325 = vmatprep.subr.mxu0 %v635_v49 }
  0xe5   :  { %1278 = vmatprep.subr.mxu1 %v332_v50  ;;  %1326 = vmatpush3.msra.mxu0 %v635_v49  ;;  %v926_v49 = vld [vmem:[#allocation6 + $0x78] sm:$0xff] }
  0xe6   :  { %1279 = vmatpush3.msra.mxu1 %v332_v50  ;;  %1327 = vmatprep.subr.mxu0 %v634_v51  ;;  %v909_v50 = vmul.f32 %v1152_v46, %v1691_v6  ;;  %v920_v6 = vld [vmem:[#allocation6 + $0x48] sm:$0xff] }
  0xe7   :  { %1280 = vmatprep.subr.mxu1 %v331_v52  ;;  %1328 = vmatpush3.msra.mxu0 %v634_v51  ;;  %v925_v51 = vld [vmem:[#allocation6 + $0x70] sm:$0xff] }
  0xe8   :  { %1281 = vmatpush3.msra.mxu1 %v331_v52  ;;  %1329 = vmatprep.subr.mxu0 %v633_v53  ;;  %v923_v52 = vld [vmem:[#allocation6 + $0x60] sm:$0xff] }
  0xe9   :  { %1282 = vmatprep.subr.mxu1 %v330_v54  ;;  %1330 = vmatpush3.msra.mxu0 %v633_v53  ;;  %v922_v53 = vld [vmem:[#allocation6 + $0x58] sm:$0xff] }
  0xea   :  { %1283 = vmatpush3.msra.mxu1 %v330_v54  ;;  %1331 = vmatprep.subr.mxu0 %v632_v55  ;;  %v921_v54 = vld [vmem:[#allocation6 + $0x50] sm:$0xff] }
  0xeb   :  { %1284 = vmatprep.subr.mxu1 %v329_v56  ;;  %1332 = vmatpush3.msra.mxu0 %v632_v55  ;;  %v919_v55 = vld [vmem:[#allocation6 + $0x40] sm:$0xff] }
  0xec   :  { %1285 = vmatpush3.msra.mxu1 %v329_v56  ;;  %1333 = vmatprep.subr.mxu0 %v631_v57  ;;  %v918_v56 = vld [vmem:[#allocation6 + $0x38] sm:$0xff] }
  0xed   :  { %1286 = vmatprep.subr.mxu1 %v328_v58  ;;  %1334 = vmatpush3.msra.mxu0 %v631_v57  ;;  %v917_v57 = vld [vmem:[#allocation6 + $0x30] sm:$0xff] }
  0xee   :  { %1287 = vmatpush3.msra.mxu1 %v328_v58  ;;  %1335 = vmatprep.subr.mxu0 %v630_v59  ;;  %v916_v58 = vld [vmem:[#allocation6 + $0x28] sm:$0xff] }
  0xef   :  { %1288 = vmatprep.subr.mxu1 %v327_v60  ;;  %1336 = vmatpush3.msra.mxu0 %v630_v59  ;;  %v915_v59 = vld [vmem:[#allocation6 + $0x20] sm:$0xff] }
  0xf0   :  { %1289 = vmatpush3.msra.mxu1 %v327_v60  ;;  %1337 = vmatprep.subr.mxu0 %v629_v61  ;;  %v914_v60 = vld [vmem:[#allocation6 + $0x18] sm:$0xff] }
  0xf1   :  { %1290 = vmatprep.subr.mxu1 %v326_v62  ;;  %1338 = vmatpush3.msra.mxu0 %v629_v61  ;;  %v913_v61 = vld [vmem:[#allocation6 + $0x10] sm:$0xff] }
  0xf2   :  { %1291 = vmatpush3.msra.mxu1 %v326_v62  ;;  %1391 = vmatprep.subr.mxu0 %v1552_v17  ;;  %v912_v62 = vld [vmem:[#allocation6 + $0x8] sm:$0xff] }
 0x18a   :  { %v1254_v63 = vpop.f32.mrf.mxu0 }
 0x18c   :  { %v219_v0 = vpop.f32.mrf.mxu0 }
 0x18e   :  { %v1301_v1 = vpop.f32.mrf.mxu0 }
 0x190   :  { %v523_v2 = vpop.f32.mrf.mxu0 }
 0x192   :  { %v1306_v3 = vpop.f32.mrf.mxu0 }
 0x193   :  { %v1259_v4 = vpop.f32.mrf.mxu1  ;;  %v628_v11 = vmul.f32 %v1306_v3, %v1301_v1 }
 0x194   :  { %v618_v7 = vpop.f32.mrf.mxu0  ;;  %v325_v14 = vmul.f32 %v1259_v4, %v1254_v63  ;;  %v911_v63 = vld [vmem:[#allocation6] sm:$0xff] }
 0x195   :  { %v627_v8 = vmul.f32 %v618_v7, %v523_v2  ;;  %v315_v10 = vpop.f32.mrf.mxu1 }
 0x196   :  { %v324_v12 = vmul.f32 %v315_v10, %v219_v0  ;;  %v910_v0 = vmul.f32 %v1152_v46, %v1688_v5  ;;  %v1153_v5 = vld [vmem:[%s1869_s15] ss:$0 sm:$0xff] }
 0x197   :  { %1339 = vmatprep.mubr.f32.mxu0 %v627_v8 }
 0x198   :  { %1292 = vmatprep.mubr.f32.mxu1 %v324_v12  ;;  %1340 = vmatmul.mubr.f32.vlgmr.msra.gmra.mxu0 %v628_v11 }
 0x199   :  { %1293 = vmatmul.mubr.f32.vlgmr.msra.gmra.mxu1 %v325_v14  ;;  %1392 = vmatpush3.msra.mxu0 %v1041_v23 }
 0x19a   :  { %1346 = vmatprep.mubr.msk.f32.mxu1 %vm146_vm0, %v738_v21  ;;  %1393 = vmatprep.subr.mxu0 %v1552_v17 }
 0x19b   :  { %1394 = vmatpush3.msra.mxu0 %v1040_v24  ;;  %1423 = vmatprep.mubr.msk.f32.mxu0 %vm1553_vm12, %v1552_v17 }
 0x19c   :  { %1395 = vmatprep.subr.mxu0 %v1552_v17 }
 0x19d   :  { %1396 = vmatpush3.msra.mxu0 %v1039_v25 }
 0x19e   :  { %1397 = vmatprep.subr.mxu0 %v1552_v17 }
 0x19f   :  { %1398 = vmatpush3.msra.mxu0 %v1038_v26 }
 0x1a0   :  { %1399 = vmatprep.subr.mxu0 %v1552_v17 }
 0x1a1   :  { %1400 = vmatpush3.msra.mxu0 %v1037_v27 }
 0x1a2   :  { %1401 = vmatprep.subr.mxu0 %v1552_v17 }
 0x1a3   :  { %1402 = vmatpush3.msra.mxu0 %v1036_v28 }
 0x1a4   :  { %1403 = vmatprep.subr.mxu0 %v1552_v17 }
 0x1a5   :  { %1404 = vmatpush3.msra.mxu0 %v1035_v29 }
 0x1a6   :  { %1405 = vmatprep.subr.mxu0 %v1552_v17 }
 0x1a7   :  { %1406 = vmatpush3.msra.mxu0 %v1034_v30 }
 0x1a8   :  { %1407 = vmatprep.subr.mxu0 %v1552_v17 }
 0x1a9   :  { %1408 = vmatpush3.msra.mxu0 %v1033_v31 }
 0x1aa   :  { %1409 = vmatprep.subr.mxu0 %v1552_v17 }
 0x1ab   :  { %1410 = vmatpush3.msra.mxu0 %v1032_v32 }
 0x1ac   :  { %1411 = vmatprep.subr.mxu0 %v1552_v17 }
 0x1ad   :  { %1412 = vmatpush3.msra.mxu0 %v1031_v33 }
 0x1ae   :  { %1413 = vmatprep.subr.mxu0 %v1552_v17 }
 0x1af   :  { %1414 = vmatpush3.msra.mxu0 %v1030_v34 }
 0x1b0   :  { %1415 = vmatprep.subr.mxu0 %v1552_v17 }
 0x1b1   :  { %1416 = vmatpush3.msra.mxu0 %v1029_v35 }
 0x1b2   :  { %1417 = vmatprep.subr.mxu0 %v1552_v17 }
 0x1b3   :  { %1418 = vmatpush3.msra.mxu0 %v1028_v36 }
 0x1b4   :  { %1419 = vmatprep.subr.mxu0 %v1552_v17 }
 0x1b5   :  { %1420 = vmatpush3.msra.mxu0 %v1027_v37 }
 0x1b6   :  { %1421 = vmatprep.subr.mxu0 %v1552_v17 }
 0x1b7   :  { %1422 = vmatpush3.msra.mxu0 %v1026_v38 }
 0x1b8   :  { %1424 = vmatmul.mubr.f32.vlgmr.msra.gmra.mxu0 %v1704_v9  ;;  %v1134_v9 = vsel %vm423_vm14, 1.0, %v1552_v17  ;;  %v924_v17 = vld [vmem:[#allocation6 + $0x68] sm:$0xff] }
 0x1b9   :  { %v436_v47 = vmul.f32 %v1135_v41, %v1134_v9 }
 0x258   :  { %v1341_v42 = vpop.f32.mrf.mxu0 }
 0x259   :  { %1342 = vmatprep.subr.mxu1 %v1341_v42  ;;  %v1294_v43 = vpop.f32.mrf.mxu1 }
 0x25a   :  { %v711_v44 = vpop.f32.mrf.mxu0  ;;  %1343 = vmatpush3.msra.mxu1 %v1341_v42 }
 0x25b   :  { %1344 = vmatprep.subr.mxu1 %v711_v44  ;;  %v408_v48 = vpop.f32.mrf.mxu1 }
 0x25c   :  { %1345 = vmatpush3.msra.mxu1 %v711_v44 }
 0x25d   :  { %1347 = vmatmul.mubr.msk.f32.vlgmr.msra.gmra.mxu1 %vm146_vm0, %v1803_v22  ;;  %1349 = vmatprep.subr.mxu1 %v1294_v43 }
 0x25e   :  { %1350 = vmatpush3.msra.mxu1 %v1294_v43  ;;  %1353 = vmatprep.mubr.msk.f32.mxu1 %vm146_vm0, %v435_v45 }
 0x25f   :  { %1351 = vmatprep.subr.mxu1 %v408_v48 }
 0x260   :  { %1352 = vmatpush3.msra.mxu1 %v408_v48 }
 0x261   :  { %1354 = vmatmul.mubr.msk.f32.vlgmr.msra.gmra.mxu1 %vm146_vm0, %v436_v47  ;;  %1356 = vmatprep.subr.mxu1 %v926_v49 }
 0x262   :  { %1357 = vmatpush3.msra.mxu1 %v926_v49  ;;  %1388 = vmatprep.mubr.f32.mxu1 %v909_v50 }
 0x263   :  { %1358 = vmatprep.subr.mxu1 %v925_v51 }
 0x264   :  { %1359 = vmatpush3.msra.mxu1 %v925_v51 }
 0x265   :  { %1360 = vmatprep.subr.mxu1 %v924_v17 }
 0x266   :  { %1361 = vmatpush3.msra.mxu1 %v924_v17 }
 0x267   :  { %1362 = vmatprep.subr.mxu1 %v923_v52 }
 0x268   :  { %1363 = vmatpush3.msra.mxu1 %v923_v52 }
 0x269   :  { %1364 = vmatprep.subr.mxu1 %v922_v53 }
 0x26a   :  { %1365 = vmatpush3.msra.mxu1 %v922_v53 }
 0x26b   :  { %1366 = vmatprep.subr.mxu1 %v921_v54 }
 0x26c   :  { %1367 = vmatpush3.msra.mxu1 %v921_v54 }
 0x26d   :  { %1368 = vmatprep.subr.mxu1 %v920_v6 }
 0x26e   :  { %1369 = vmatpush3.msra.mxu1 %v920_v6 }
 0x26f   :  { %1370 = vmatprep.subr.mxu1 %v919_v55 }
 0x270   :  { %1371 = vmatpush3.msra.mxu1 %v919_v55 }
 0x271   :  { %1372 = vmatprep.subr.mxu1 %v918_v56 }
 0x272   :  { %1373 = vmatpush3.msra.mxu1 %v918_v56 }
 0x273   :  { %1374 = vmatprep.subr.mxu1 %v917_v57 }
 0x274   :  { %1375 = vmatpush3.msra.mxu1 %v917_v57 }
 0x275   :  { %1376 = vmatprep.subr.mxu1 %v916_v58 }
 0x276   :  { %1377 = vmatpush3.msra.mxu1 %v916_v58 }
 0x277   :  { %1378 = vmatprep.subr.mxu1 %v915_v59 }
 0x278   :  { %1379 = vmatpush3.msra.mxu1 %v915_v59  ;;  %v1108_v1 = vpop.f32.mrf.mxu0 }
 0x279   :  { %1380 = vmatprep.subr.mxu1 %v914_v60  ;;  %1112 = vst [vmem:[%s1872_s18] sm:$0xff] %v1108_v1 }
 0x27a   :  { %1381 = vmatpush3.msra.mxu1 %v914_v60  ;;  %v1425_v2 = vpop.f32.mrf.mxu0 }
 0x27b   :  { %1382 = vmatprep.subr.mxu1 %v913_v61 }
 0x27c   :  { %1383 = vmatpush3.msra.mxu1 %v913_v61 }
 0x27d   :  { %1384 = vmatprep.subr.mxu1 %v912_v62 }
 0x27e   :  { %1385 = vmatpush3.msra.mxu1 %v912_v62 }
 0x27f   :  { %1386 = vmatprep.subr.mxu1 %v911_v63 }
 0x280   :  { %1387 = vmatpush3.msra.mxu1 %v911_v63 }
 0x281   :  { %1389 = vmatmul.mubr.f32.vlgmr.msra.gmra.mxu1 %v910_v0 }
 0x31d   :  { %v1348_v3 = vpop.f32.mrf.mxu1 }
 0x31f   :  { %v812_v4 = vpop.f32.mrf.mxu1 }
 0x321   :  { %v1355_v7 = vpop.f32.mrf.mxu1 }
 0x322   :  { %v899_v10 = vadd.f32 %v1355_v7, %v1348_v3 }
 0x323   :  { %v893_v8 = vpop.f32.mrf.mxu1 }
 0x324   :  { %v894_v12 = vadd.f32 %v893_v8, %v812_v4 }
 0x341   :  { %v1390_v11 = vpop.f32.mrf.mxu1 }
 0x342   :  { %v1003_v14 = vadd.f32 %v1390_v11, %v899_v10 }
 0x343   :  { %v993_v15 = vpop.f32.mrf.mxu1 }
 0x344   :  { %v1005_v16 = vmul.f32 0.33333334, %v1003_v14  ;;  %v1002_v18 = vadd.f32 %v993_v15, %v894_v12 }
 0x346   :  { %v1014_v20 = vmul.f32 %v1153_v5, %v1005_v16  ;;  %v1004_v13 = vmul.f32 0.33333334, %v1002_v18 }
 0x348   :  { %v1023_v21 = vadd.f32 %v1154_v19, %v1014_v20  ;;  %v1013_v22 = vmul.f32 %v1153_v5, %v1004_v13 }
 0x34a   :  { %1025 = vst [vmem:[%s1871_s17 + $0x8] sm:$0xff] %v1023_v21  ;;  %v1022_v23 = vadd.f32 %v1154_v19, %v1013_v22 }
 0x34c   :  { %1024 = vst [vmem:[%s1871_s17] sm:$0xff] %v1022_v23 }
 0x34d   :  { %1121 = vsyncpa [#allocation3], 1 }
 0x34e   :  { %1122 = vsyncpa [#allocation5], 1 }
 0x34f   :  { %1123 = vsyncpa [#allocation8], 1 }

// kernel: kggcn_forward.5
= control target key start
LH: loop header
LB: loop body
LE: loop exit
PB: predicated region body
PF: predicated region fallthrough
CT: control target
= control target key end

     0   :  { %v1362_v0 = vmov 0   ;;  %v61_v13 = vlaneseq  ;;  %vm80_vm0 = vcmask 130048   ;;  %v1363_v17 = vmov 0.0   ;;  %s1791_s6 = inlined_call_operand.vmem [shape: s32[16,1], index: 6, kind: input, shape index: {}]   ;;  %s1792_s2 = inlined_call_operand.vmem [shape: s32[16,1], index: 2, kind: input, shape index: {}]   ;;  %s1793_s0 = inlined_call_operand.vmem [shape: f32[16,128], index: 0, kind: input, shape index: {}]   ;;  %s1794_s7 = inlined_call_operand.vmem [shape: s32[16,1], index: 7, kind: input, shape index: {}]   ;;  %s1795_s1 = inlined_call_operand.vmem [shape: f32[8,128], index: 1, kind: input, shape index: {}]   ;;  %s1796_s3 = inlined_call_operand.vmem [shape: s32[16,1], index: 3, kind: input, shape index: {}]   ;;  %s1797_s10 = inlined_call_operand.vmem [shape: f32[128,128], index: 10, kind: input, shape index: {}]   ;;  %s1798_s11 = inlined_call_operand.vmem [shape: f32[128,128], index: 11, kind: input, shape index: {}]   ;;  %s1799_s8 = inlined_call_operand.vmem [shape: s32[1,16], index: 8, kind: input, shape index: {}]   ;;  %s1800_s9 = inlined_call_operand.vmem [shape: f32[1,16], index: 9, kind: input, shape index: {}]   ;;  %s1801_s13 = inlined_call_operand.vmem [shape: f32[128,128], index: 13, kind: input, shape index: {}]   ;;  %s1802_s4 = inlined_call_operand.vmem [shape: s32[1,16], index: 4, kind: input, shape index: {}]   ;;  %s1803_s5 = inlined_call_operand.vmem [shape: f32[1,16], index: 5, kind: input, shape index: {}]   ;;  %s1804_s14 = inlined_call_operand.vmem [shape: f32[1,128], index: 14, kind: input, shape index: {}]   ;;  %s1805_s12 = inlined_call_operand.vmem [shape: f32[128,128], index: 12, kind: input, shape index: {}]   ;;  %s1806_s18 = inlined_call_operand.vmem [shape: f32[8,128], index: 18, kind: output, shape index: {1}]   ;;  %s1807_s15 = inlined_call_operand.vmem [shape: f32[1,128], index: 15, kind: input, shape index: {}]   ;;  %s1808_s16 = inlined_call_operand.vmem [shape: f32[1,128], index: 16, kind: input, shape index: {}]   ;;  %s1809_s17 = inlined_call_operand.vmem [shape: f32[16,128], index: 17, kind: output, shape index: {0}]  }
   0x1   :  { %1813 = sst [smem:[#allocation2_spill]] %s1791_s6  ;;  %1361 = vset.pattern.permute.xlu1 %v1362_v0  ;;  %1360 = vset.pattern.permute.xlu0 %v1362_v0  ;;  %v467_v7 = vld [vmem:[%s1794_s7 + $0x8] sm:$0xff]  ;;  %v466_v8 = vld [vmem:[%s1794_s7] sm:$0xff]  ;;  %v275_v12 = vld [vmem:[%s1797_s10 + $0x78] sm:$0xff]  ;;  %vm176_vm6 = vcmask 64512   ;;  %vm1364_vm12 = vmmov 0  }
   0x2   :  { %1814 = sst [smem:[#allocation3_spill]] %s1792_s2  ;;  %v1495_v9 = vld [vmem:[%s1795_s1] sm:$0xff]  ;;  %v163_v10 = vld [vmem:[%s1796_s3 + $0x8] sm:$0xff]  ;;  %v62_v14 = vand.u32 127, %v61_v13  ;;  %v578_v27 = vld [vmem:[%s1798_s11 + $0x78] sm:$0xff] }
   0x3   :  { %1815 = sst [smem:[#allocation4_spill]] %s1793_s0  ;;  %1186 = vmatprep.subr.mxu1 %v1495_v9  ;;  %v162_v11 = vld [vmem:[%s1796_s3] sm:$0xff]  ;;  %v577_v33 = vld [vmem:[%s1798_s11 + $0x70] sm:$0xff]  ;;  %v576_v35 = vld [vmem:[%s1798_s11 + $0x68] sm:$0xff] }
   0x4   :  { %s1816_s29 = sld [smem:[#allocation2_spill]]  ;;  %1187 = vmatpush3.msra.mxu1 %v1495_v9  ;;  %v274_v34 = vld [vmem:[%s1797_s10 + $0x70] sm:$0xff]  ;;  %v273_v36 = vld [vmem:[%s1797_s10 + $0x68] sm:$0xff]  ;;  %v575_v37 = vld [vmem:[%s1798_s11 + $0x60] sm:$0xff] }
   0x5   :  { %s1817_s19 = sld [smem:[#allocation3_spill]]  ;;  %1191 = vmatprep.subr.mxu1 %v275_v12  ;;  %v272_v38 = vld [vmem:[%s1797_s10 + $0x60] sm:$0xff]  ;;  %v574_v39 = vld [vmem:[%s1798_s11 + $0x58] sm:$0xff]  ;;  %v573_v41 = vld [vmem:[%s1798_s11 + $0x50] sm:$0xff] }
   0x6   :  { %s1818_s24 = sld [smem:[#allocation4_spill]]  ;;  %v271_v40 = vld [vmem:[%s1797_s10 + $0x58] sm:$0xff]  ;;  %v270_v42 = vld [vmem:[%s1797_s10 + $0x50] sm:$0xff]  ;;  %v572_v43 = vld [vmem:[%s1798_s11 + $0x48] sm:$0xff] }
   0x7   :  { %v269_v44 = vld [vmem:[%s1797_s10 + $0x48] sm:$0xff]  ;;  %v571_v45 = vld [vmem:[%s1798_s11 + $0x40] sm:$0xff]  ;;  %v570_v47 = vld [vmem:[%s1798_s11 + $0x38] sm:$0xff] }
   0x8   :  { %v268_v46 = vld [vmem:[%s1797_s10 + $0x40] sm:$0xff]  ;;  %v267_v48 = vld [vmem:[%s1797_s10 + $0x38] sm:$0xff]  ;;  %v569_v49 = vld [vmem:[%s1798_s11 + $0x30] sm:$0xff] }
   0x9   :  { %v266_v50 = vld [vmem:[%s1797_s10 + $0x30] sm:$0xff]  ;;  %v568_v51 = vld [vmem:[%s1798_s11 + $0x28] sm:$0xff]  ;;  %v567_v53 = vld [vmem:[%s1798_s11 + $0x20] sm:$0xff] }
   0xa   :  { %v371_v1 = vld [vmem:[%s1816_s29] sm:$0xff]  ;;  %v372_v3 = vld [vmem:[%s1816_s29 + $0x8] sm:$0xff]  ;;  %v566_v55 = vld [vmem:[%s1798_s11 + $0x18] sm:$0xff] }
   0xb   :  { %v66_v2 = vld [vmem:[%s1817_s19] sm:$0xff]  ;;  %374 = vperm.xlu1 %1361, %v371_v1   ;;  %v67_v4 = vld [vmem:[%s1817_s19 + $0x8] sm:$0xff]  ;;  %v263_v56 = vld [vmem:[%s1797_s10 + $0x18] sm:$0xff] }
   0xc   :  { %69 = vperm.xlu0 %1360, %v66_v2   ;;  %v1475_v5 = vld [vmem:[%s1818_s24 + $0x8] sm:$0xff]  ;;  %v1481_v6 = vld [vmem:[%s1818_s24] sm:$0xff]  ;;  %v565_v57 = vld [vmem:[%s1798_s11 + $0x10] sm:$0xff] }
   0xd   :  { %1179 = vmatprep.subr.mxu0 %v1475_v5  ;;  %v265_v52 = vld [vmem:[%s1797_s10 + $0x28] sm:$0xff]  ;;  %v264_v54 = vld [vmem:[%s1797_s10 + $0x20] sm:$0xff]  ;;  %v262_v58 = vld [vmem:[%s1797_s10 + $0x10] sm:$0xff] }
   0xe   :  { %1180 = vmatpush3.msra.mxu0 %v1475_v5  ;;  %v564_v59 = vld [vmem:[%s1798_s11 + $0x8] sm:$0xff]  ;;  %v563_v61 = vld [vmem:[%s1798_s11] sm:$0xff] }
   0xf   :  { %377 = vperm.xlu1 %1361, %v372_v3   ;;  %1181 = vmatprep.subr.mxu0 %v1481_v6  ;;  %v261_v60 = vld [vmem:[%s1797_s10 + $0x8] sm:$0xff]  ;;  %v260_v62 = vld [vmem:[%s1797_s10] sm:$0xff] }
  0x10   :  { %72 = vperm.xlu0 %1360, %v67_v4   ;;  %1182 = vmatpush3.msra.mxu0 %v1481_v6 }
  0x11   :  { %1226 = vmatprep.subr.mxu0 %v1475_v5 }
  0x13   :  { %472 = vperm.xlu1 %1361, %v467_v7  }
  0x14   :  { %469 = vperm.xlu0 %1360, %v466_v8  }
  0x17   :  { %168 = vperm.xlu1 %1361, %v163_v10  }
  0x18   :  { %165 = vperm.xlu0 %1360, %v162_v11  }
  0x86   :  { %v375_v15 = vpop.permute.xlu1 %374 }
  0x87   :  { %v70_v16 = vpop.permute.xlu0 %69  ;;  %vm379_vm2 = vcmp.eq.s32.totalorder %v62_v14, %v375_v15  ;;  %v1626_v15 = vshrl.u32 %v61_v13, 7 }
  0x88   :  { %vm74_vm1 = vcmp.eq.s32.totalorder %v62_v14, %v70_v16  ;;  %v1067_v21 = vsel %vm379_vm2, 1.0, %v1363_v17 }
  0x89   :  { %v1055_v18 = vsel %vm74_vm1, 1.0, %v1363_v17  ;;  %v1629_v16 = vadd.s32 8, %v1626_v15 }
  0x8a   :  { %1183 = vmatprep.mubr.msk.f32.mxu0 %vm80_vm0, %v1055_v18  ;;  %v378_v19 = vpop.permute.xlu1 %377  ;;  %v1075_v18 = vld [vmem:[%s1799_s8] ss:$0 sm:$0xff] }
  0x8b   :  { %v73_v20 = vpop.permute.xlu0 %72  ;;  %vm380_vm4 = vcmp.eq.s32.totalorder %v62_v14, %v378_v19  ;;  %vm659_vm10 = vcmp.eq.s32.totalorder %v1626_v15, %v1075_v18  ;;  %vm660_vm11 = vcmp.eq.s32.totalorder %v1629_v16, %v1075_v18 }
  0x8c   :  { %vm75_vm3 = vcmp.eq.s32.totalorder %v62_v14, %v73_v20  ;;  %v1068_v25 = vsel %vm380_vm4, 1.0, %v1363_v17  ;;  %v1076_v19 = vsel %vm659_vm10, 1.0, %v1363_v17  ;;  %v1078_v20 = vld [vmem:[%s1800_s9] ss:$0 sm:$0xff]  ;;  %v1077_v13 = vsel %vm660_vm11, 1.0, %v1363_v17 }
  0x8d   :  { %v1056_v22 = vsel %vm75_vm3, 1.0, %v1363_v17 }
  0x8e   :  { %1184 = vmatmul.mubr.msk.f32.vlgmr.msra.gmra.mxu0 %vm80_vm0, %v1056_v22  ;;  %v473_v23 = vpop.permute.xlu1 %472  ;;  %v1641_v22 = vmul.f32 %v1078_v20, %v1077_v13 }
  0x8f   :  { %1227 = vmatpush3.msra.mxu0 %v1475_v5  ;;  %v470_v24 = vpop.permute.xlu0 %469  ;;  %1230 = vmatprep.mubr.msk.f32.mxu0 %vm80_vm0, %v1067_v21  ;;  %vm475_vm7 = vcmp.eq.s32.totalorder %v62_v14, %v473_v23  ;;  %v672_v21 = vmul.f32 %v1078_v20, %v1076_v19  ;;  %v975_v23 = vld [vmem:[%s1801_s13 + $0x78] sm:$0xff]  ;;  %v1085_v19 = vld [vmem:[%s1808_s16] ss:$0 sm:$0xff] }
  0x90   :  { %vm474_vm5 = vcmp.eq.s32.totalorder %v62_v14, %v470_v24  ;;  %1228 = vmatprep.subr.mxu0 %v1481_v6  ;;  %v1072_v30 = vsel %vm475_vm7, 1.0, %v1363_v17  ;;  %v974_v24 = vld [vmem:[%s1801_s13 + $0x70] sm:$0xff] }
  0x91   :  { %v1071_v26 = vsel %vm474_vm5, 1.0, %v1363_v17  ;;  %1229 = vmatpush3.msra.mxu0 %v1481_v6 }
  0x92   :  { %1233 = vmatprep.subr.mxu0 %v1495_v9  ;;  %1231 = vmatmul.mubr.msk.f32.vlgmr.msra.gmra.mxu0 %vm80_vm0, %v1068_v25  ;;  %v169_v28 = vpop.permute.xlu1 %168  ;;  %v973_v25 = vld [vmem:[%s1801_s13 + $0x68] sm:$0xff] }
  0x93   :  { %1234 = vmatpush3.msra.mxu0 %v1495_v9  ;;  %v166_v29 = vpop.permute.xlu0 %165  ;;  %1235 = vmatprep.mubr.msk.f32.mxu0 %vm176_vm6, %v1071_v26  ;;  %vm171_vm8 = vcmp.eq.s32.totalorder %v62_v14, %v169_v28  ;;  %v972_v26 = vld [vmem:[%s1801_s13 + $0x60] sm:$0xff]  ;;  %v970_v28 = vld [vmem:[%s1801_s13 + $0x50] sm:$0xff] }
  0x94   :  { %vm170_vm9 = vcmp.eq.s32.totalorder %v62_v14, %v166_v29  ;;  %1238 = vmatprep.subr.mxu0 %v578_v27  ;;  %v1060_v31 = vsel %vm171_vm8, 1.0, %v1363_v17  ;;  %v969_v29 = vld [vmem:[%s1801_s13 + $0x48] sm:$0xff] }
  0x95   :  { %v1059_v32 = vsel %vm170_vm9, 1.0, %v1363_v17 }
  0x96   :  { %1188 = vmatprep.mubr.msk.f32.mxu1 %vm176_vm6, %v1059_v32  ;;  %1236 = vmatmul.mubr.msk.f32.vlgmr.msra.gmra.mxu0 %vm176_vm6, %v1072_v30  ;;  %v968_v30 = vld [vmem:[%s1801_s13 + $0x40] sm:$0xff]  ;;  %v966_v32 = vld [vmem:[%s1801_s13 + $0x30] sm:$0xff] }
  0x97   :  { %1189 = vmatmul.mubr.msk.f32.vlgmr.msra.gmra.mxu1 %vm176_vm6, %v1060_v31  ;;  %1239 = vmatpush3.msra.mxu0 %v578_v27  ;;  %v971_v27 = vld [vmem:[%s1801_s13 + $0x58] sm:$0xff] }
  0x98   :  { %1192 = vmatpush3.msra.mxu1 %v275_v12  ;;  %1240 = vmatprep.subr.mxu0 %v577_v33  ;;  %v967_v31 = vld [vmem:[%s1801_s13 + $0x38] sm:$0xff] }
  0x99   :  { %1193 = vmatprep.subr.mxu1 %v274_v34  ;;  %1241 = vmatpush3.msra.mxu0 %v577_v33  ;;  %v965_v33 = vld [vmem:[%s1801_s13 + $0x28] sm:$0xff] }
  0x9a   :  { %1194 = vmatpush3.msra.mxu1 %v274_v34  ;;  %1242 = vmatprep.subr.mxu0 %v576_v35  ;;  %v964_v34 = vld [vmem:[%s1801_s13 + $0x20] sm:$0xff] }
  0x9b   :  { %1195 = vmatprep.subr.mxu1 %v273_v36  ;;  %1243 = vmatpush3.msra.mxu0 %v576_v35  ;;  %v963_v35 = vld [vmem:[%s1801_s13 + $0x18] sm:$0xff] }
  0x9c   :  { %1196 = vmatpush3.msra.mxu1 %v273_v36  ;;  %1244 = vmatprep.subr.mxu0 %v575_v37  ;;  %v962_v36 = vld [vmem:[%s1801_s13 + $0x10] sm:$0xff] }
  0x9d   :  { %1197 = vmatprep.subr.mxu1 %v272_v38  ;;  %1245 = vmatpush3.msra.mxu0 %v575_v37  ;;  %v961_v37 = vld [vmem:[%s1801_s13 + $0x8] sm:$0xff] }
  0x9e   :  { %1198 = vmatpush3.msra.mxu1 %v272_v38  ;;  %1246 = vmatprep.subr.mxu0 %v574_v39  ;;  %v960_v38 = vld [vmem:[%s1801_s13] sm:$0xff] }
  0x9f   :  { %1199 = vmatprep.subr.mxu1 %v271_v40  ;;  %1247 = vmatpush3.msra.mxu0 %v574_v39  ;;  %v1063_v39 = vld [vmem:[%s1802_s4] ss:$0 sm:$0xff] }
  0xa0   :  { %1200 = vmatpush3.msra.mxu1 %v271_v40  ;;  %1248 = vmatprep.subr.mxu0 %v573_v41  ;;  %vm356_vm13 = vcmp.eq.s32.totalorder %v1626_v15, %v1063_v39  ;;  %vm357_vm14 = vcmp.eq.s32.totalorder %v1629_v16, %v1063_v39 }
  0xa1   :  { %1201 = vmatprep.subr.mxu1 %v270_v42  ;;  %1249 = vmatpush3.msra.mxu0 %v573_v41  ;;  %v1064_v40 = vsel %vm356_vm13, 1.0, %v1363_v17  ;;  %v1066_v41 = vld [vmem:[%s1803_s5] ss:$0 sm:$0xff] }
  0xa2   :  { %1202 = vmatpush3.msra.mxu1 %v270_v42  ;;  %1250 = vmatprep.subr.mxu0 %v572_v43 }
  0xa3   :  { %1203 = vmatprep.subr.mxu1 %v269_v44  ;;  %1251 = vmatpush3.msra.mxu0 %v572_v43 }
  0xa4   :  { %1204 = vmatpush3.msra.mxu1 %v269_v44  ;;  %1252 = vmatprep.subr.mxu0 %v571_v45 }
  0xa5   :  { %1205 = vmatprep.subr.mxu1 %v268_v46  ;;  %1253 = vmatpush3.msra.mxu0 %v571_v45  ;;  %v369_v45 = vmul.f32 %v1066_v41, %v1064_v40 }
  0xa6   :  { %1206 = vmatpush3.msra.mxu1 %v268_v46  ;;  %1254 = vmatprep.subr.mxu0 %v570_v47  ;;  %v1083_v46 = vld [vmem:[%s1804_s14] ss:$0 sm:$0xff] }
  0xa7   :  { %1207 = vmatprep.subr.mxu1 %v267_v48  ;;  %1255 = vmatpush3.msra.mxu0 %v570_v47 }
  0xa8   :  { %1208 = vmatpush3.msra.mxu1 %v267_v48  ;;  %1256 = vmatprep.subr.mxu0 %v569_v49 }
  0xa9   :  { %1209 = vmatprep.subr.mxu1 %v266_v50  ;;  %1257 = vmatpush3.msra.mxu0 %v569_v49  ;;  %v843_v49 = vmul.f32 %v1083_v46, %v1481_v6  ;;  %v857_v6 = vld [vmem:[%s1805_s12 + $0x60] sm:$0xff] }
  0xaa   :  { %1210 = vmatpush3.msra.mxu1 %v266_v50  ;;  %1258 = vmatprep.subr.mxu0 %v568_v51  ;;  %v859_v50 = vld [vmem:[%s1805_s12 + $0x70] sm:$0xff] }
  0xab   :  { %1211 = vmatprep.subr.mxu1 %v265_v52  ;;  %1259 = vmatpush3.msra.mxu0 %v568_v51  ;;  %v858_v51 = vld [vmem:[%s1805_s12 + $0x68] sm:$0xff] }
  0xac   :  { %1212 = vmatpush3.msra.mxu1 %v265_v52  ;;  %1260 = vmatprep.subr.mxu0 %v567_v53  ;;  %v856_v52 = vld [vmem:[%s1805_s12 + $0x58] sm:$0xff] }
  0xad   :  { %1213 = vmatprep.subr.mxu1 %v264_v54  ;;  %1261 = vmatpush3.msra.mxu0 %v567_v53  ;;  %v855_v53 = vld [vmem:[%s1805_s12 + $0x50] sm:$0xff] }
  0xae   :  { %1214 = vmatpush3.msra.mxu1 %v264_v54  ;;  %1262 = vmatprep.subr.mxu0 %v566_v55  ;;  %v854_v54 = vld [vmem:[%s1805_s12 + $0x48] sm:$0xff] }
  0xaf   :  { %1215 = vmatprep.subr.mxu1 %v263_v56  ;;  %1263 = vmatpush3.msra.mxu0 %v566_v55  ;;  %v853_v55 = vld [vmem:[%s1805_s12 + $0x40] sm:$0xff] }
  0xb0   :  { %1216 = vmatpush3.msra.mxu1 %v263_v56  ;;  %1264 = vmatprep.subr.mxu0 %v565_v57  ;;  %v852_v56 = vld [vmem:[%s1805_s12 + $0x38] sm:$0xff] }
  0xb1   :  { %1217 = vmatprep.subr.mxu1 %v262_v58  ;;  %1265 = vmatpush3.msra.mxu0 %v565_v57  ;;  %v851_v57 = vld [vmem:[%s1805_s12 + $0x30] sm:$0xff] }
  0xb2   :  { %1218 = vmatpush3.msra.mxu1 %v262_v58  ;;  %1266 = vmatprep.subr.mxu0 %v564_v59  ;;  %v850_v58 = vld [vmem:[%s1805_s12 + $0x28] sm:$0xff] }
  0xb3   :  { %1219 = vmatprep.subr.mxu1 %v261_v60  ;;  %1267 = vmatpush3.msra.mxu0 %v564_v59  ;;  %v849_v59 = vld [vmem:[%s1805_s12 + $0x20] sm:$0xff] }
  0xb4   :  { %1220 = vmatpush3.msra.mxu1 %v261_v60  ;;  %1268 = vmatprep.subr.mxu0 %v563_v61  ;;  %v848_v60 = vld [vmem:[%s1805_s12 + $0x18] sm:$0xff] }
  0xb5   :  { %1221 = vmatprep.subr.mxu1 %v260_v62  ;;  %1269 = vmatpush3.msra.mxu0 %v563_v61  ;;  %v847_v61 = vld [vmem:[%s1805_s12 + $0x10] sm:$0xff] }
  0xb6   :  { %1222 = vmatpush3.msra.mxu1 %v260_v62  ;;  %1322 = vmatprep.subr.mxu0 %v1363_v17  ;;  %v846_v62 = vld [vmem:[%s1805_s12 + $0x8] sm:$0xff] }
 0x14e   :  { %v1185_v63 = vpop.f32.mrf.mxu0 }
 0x150   :  { %v153_v0 = vpop.f32.mrf.mxu0 }
 0x152   :  { %v1232_v1 = vpop.f32.mrf.mxu0 }
 0x154   :  { %v457_v2 = vpop.f32.mrf.mxu0 }
 0x156   :  { %v1237_v3 = vpop.f32.mrf.mxu0 }
 0x157   :  { %v1190_v4 = vpop.f32.mrf.mxu1  ;;  %v562_v11 = vmul.f32 %v1237_v3, %v1232_v1 }
 0x158   :  { %v552_v7 = vpop.f32.mrf.mxu0  ;;  %v259_v14 = vmul.f32 %v1190_v4, %v1185_v63  ;;  %v845_v63 = vld [vmem:[%s1805_s12] sm:$0xff] }
 0x159   :  { %v561_v8 = vmul.f32 %v552_v7, %v457_v2  ;;  %v249_v10 = vpop.f32.mrf.mxu1 }
 0x15a   :  { %v258_v12 = vmul.f32 %v249_v10, %v153_v0  ;;  %v844_v0 = vmul.f32 %v1083_v46, %v1475_v5  ;;  %v1084_v5 = vld [vmem:[%s1807_s15] ss:$0 sm:$0xff] }
 0x15b   :  { %1270 = vmatprep.mubr.f32.mxu0 %v561_v8 }
 0x15c   :  { %1223 = vmatprep.mubr.f32.mxu1 %v258_v12  ;;  %1271 = vmatmul.mubr.f32.vlgmr.msra.gmra.mxu0 %v562_v11 }
 0x15d   :  { %1224 = vmatmul.mubr.f32.vlgmr.msra.gmra.mxu1 %v259_v14  ;;  %1323 = vmatpush3.msra.mxu0 %v975_v23 }
 0x15e   :  { %1277 = vmatprep.mubr.msk.f32.mxu1 %vm80_vm0, %v672_v21  ;;  %1324 = vmatprep.subr.mxu0 %v1363_v17 }
 0x15f   :  { %1325 = vmatpush3.msra.mxu0 %v974_v24  ;;  %1354 = vmatprep.mubr.msk.f32.mxu0 %vm1364_vm12, %v1363_v17 }
 0x160   :  { %1326 = vmatprep.subr.mxu0 %v1363_v17 }
 0x161   :  { %1327 = vmatpush3.msra.mxu0 %v973_v25 }
 0x162   :  { %1328 = vmatprep.subr.mxu0 %v1363_v17 }
 0x163   :  { %1329 = vmatpush3.msra.mxu0 %v972_v26 }
 0x164   :  { %1330 = vmatprep.subr.mxu0 %v1363_v17 }
 0x165   :  { %1331 = vmatpush3.msra.mxu0 %v971_v27 }
 0x166   :  { %1332 = vmatprep.subr.mxu0 %v1363_v17 }
 0x167   :  { %1333 = vmatpush3.msra.mxu0 %v970_v28 }
 0x168   :  { %1334 = vmatprep.subr.mxu0 %v1363_v17 }
 0x169   :  { %1335 = vmatpush3.msra.mxu0 %v969_v29 }
 0x16a   :  { %1336 = vmatprep.subr.mxu0 %v1363_v17 }
 0x16b   :  { %1337 = vmatpush3.msra.mxu0 %v968_v30 }
 0x16c   :  { %1338 = vmatprep.subr.mxu0 %v1363_v17 }
 0x16d   :  { %1339 = vmatpush3.msra.mxu0 %v967_v31 }
 0x16e   :  { %1340 = vmatprep.subr.mxu0 %v1363_v17 }
 0x16f   :  { %1341 = vmatpush3.msra.mxu0 %v966_v32 }
 0x170   :  { %1342 = vmatprep.subr.mxu0 %v1363_v17 }
 0x171   :  { %1343 = vmatpush3.msra.mxu0 %v965_v33 }
 0x172   :  { %1344 = vmatprep.subr.mxu0 %v1363_v17 }
 0x173   :  { %1345 = vmatpush3.msra.mxu0 %v964_v34 }
 0x174   :  { %1346 = vmatprep.subr.mxu0 %v1363_v17 }
 0x175   :  { %1347 = vmatpush3.msra.mxu0 %v963_v35 }
 0x176   :  { %1348 = vmatprep.subr.mxu0 %v1363_v17 }
 0x177   :  { %1349 = vmatpush3.msra.mxu0 %v962_v36 }
 0x178   :  { %1350 = vmatprep.subr.mxu0 %v1363_v17 }
 0x179   :  { %1351 = vmatpush3.msra.mxu0 %v961_v37 }
 0x17a   :  { %1352 = vmatprep.subr.mxu0 %v1363_v17 }
 0x17b   :  { %1353 = vmatpush3.msra.mxu0 %v960_v38 }
 0x17c   :  { %1355 = vmatmul.mubr.f32.vlgmr.msra.gmra.mxu0 %v1495_v9  ;;  %v1065_v9 = vsel %vm357_vm14, 1.0, %v1363_v17  ;;  %v860_v17 = vld [vmem:[%s1805_s12 + $0x78] sm:$0xff] }
 0x17d   :  { %v370_v47 = vmul.f32 %v1066_v41, %v1065_v9 }
 0x21c   :  { %v1272_v42 = vpop.f32.mrf.mxu0 }
 0x21d   :  { %1273 = vmatprep.subr.mxu1 %v1272_v42  ;;  %v1225_v43 = vpop.f32.mrf.mxu1 }
 0x21e   :  { %v645_v44 = vpop.f32.mrf.mxu0  ;;  %1274 = vmatpush3.msra.mxu1 %v1272_v42 }
 0x21f   :  { %1275 = vmatprep.subr.mxu1 %v645_v44  ;;  %v342_v48 = vpop.f32.mrf.mxu1 }
 0x220   :  { %1276 = vmatpush3.msra.mxu1 %v645_v44 }
 0x221   :  { %1278 = vmatmul.mubr.msk.f32.vlgmr.msra.gmra.mxu1 %vm80_vm0, %v1641_v22  ;;  %1280 = vmatprep.subr.mxu1 %v1225_v43 }
 0x222   :  { %1281 = vmatpush3.msra.mxu1 %v1225_v43  ;;  %1284 = vmatprep.mubr.msk.f32.mxu1 %vm80_vm0, %v369_v45 }
 0x223   :  { %1282 = vmatprep.subr.mxu1 %v342_v48 }
 0x224   :  { %1283 = vmatpush3.msra.mxu1 %v342_v48 }
 0x225   :  { %1285 = vmatmul.mubr.msk.f32.vlgmr.msra.gmra.mxu1 %vm80_vm0, %v370_v47  ;;  %1287 = vmatprep.subr.mxu1 %v860_v17 }
 0x226   :  { %1288 = vmatpush3.msra.mxu1 %v860_v17  ;;  %1319 = vmatprep.mubr.f32.mxu1 %v843_v49 }
 0x227   :  { %1289 = vmatprep.subr.mxu1 %v859_v50 }
 0x228   :  { %1290 = vmatpush3.msra.mxu1 %v859_v50 }
 0x229   :  { %1291 = vmatprep.subr.mxu1 %v858_v51 }
 0x22a   :  { %1292 = vmatpush3.msra.mxu1 %v858_v51 }
 0x22b   :  { %1293 = vmatprep.subr.mxu1 %v857_v6 }
 0x22c   :  { %1294 = vmatpush3.msra.mxu1 %v857_v6 }
 0x22d   :  { %1295 = vmatprep.subr.mxu1 %v856_v52 }
 0x22e   :  { %1296 = vmatpush3.msra.mxu1 %v856_v52 }
 0x22f   :  { %1297 = vmatprep.subr.mxu1 %v855_v53 }
 0x230   :  { %1298 = vmatpush3.msra.mxu1 %v855_v53 }
 0x231   :  { %1299 = vmatprep.subr.mxu1 %v854_v54 }
 0x232   :  { %1300 = vmatpush3.msra.mxu1 %v854_v54 }
 0x233   :  { %1301 = vmatprep.subr.mxu1 %v853_v55 }
 0x234   :  { %1302 = vmatpush3.msra.mxu1 %v853_v55 }
 0x235   :  { %1303 = vmatprep.subr.mxu1 %v852_v56 }
 0x236   :  { %1304 = vmatpush3.msra.mxu1 %v852_v56 }
 0x237   :  { %1305 = vmatprep.subr.mxu1 %v851_v57 }
 0x238   :  { %1306 = vmatpush3.msra.mxu1 %v851_v57 }
 0x239   :  { %1307 = vmatprep.subr.mxu1 %v850_v58 }
 0x23a   :  { %1308 = vmatpush3.msra.mxu1 %v850_v58 }
 0x23b   :  { %1309 = vmatprep.subr.mxu1 %v849_v59 }
 0x23c   :  { %1310 = vmatpush3.msra.mxu1 %v849_v59  ;;  %v1042_v1 = vpop.f32.mrf.mxu0 }
 0x23d   :  { %1311 = vmatprep.subr.mxu1 %v848_v60  ;;  %1046 = vst [vmem:[%s1806_s18] sm:$0xff] %v1042_v1 }
 0x23e   :  { %1312 = vmatpush3.msra.mxu1 %v848_v60  ;;  %v1356_v2 = vpop.f32.mrf.mxu0 }
 0x23f   :  { %1313 = vmatprep.subr.mxu1 %v847_v61 }
 0x240   :  { %1314 = vmatpush3.msra.mxu1 %v847_v61 }
 0x241   :  { %1315 = vmatprep.subr.mxu1 %v846_v62 }
 0x242   :  { %1316 = vmatpush3.msra.mxu1 %v846_v62 }
 0x243   :  { %1317 = vmatprep.subr.mxu1 %v845_v63 }
 0x244   :  { %1318 = vmatpush3.msra.mxu1 %v845_v63 }
 0x245   :  { %1320 = vmatmul.mubr.f32.vlgmr.msra.gmra.mxu1 %v844_v0 }
 0x2e1   :  { %v1279_v3 = vpop.f32.mrf.mxu1 }
 0x2e3   :  { %v746_v4 = vpop.f32.mrf.mxu1 }
 0x2e5   :  { %v1286_v7 = vpop.f32.mrf.mxu1 }
 0x2e6   :  { %v833_v10 = vadd.f32 %v1286_v7, %v1279_v3 }
 0x2e7   :  { %v827_v8 = vpop.f32.mrf.mxu1 }
 0x2e8   :  { %v828_v12 = vadd.f32 %v827_v8, %v746_v4 }
 0x305   :  { %v1321_v11 = vpop.f32.mrf.mxu1 }
 0x306   :  { %v937_v14 = vadd.f32 %v1321_v11, %v833_v10 }
 0x307   :  { %v927_v15 = vpop.f32.mrf.mxu1 }
 0x308   :  { %v939_v16 = vmul.f32 0.33333334, %v937_v14  ;;  %v936_v18 = vadd.f32 %v927_v15, %v828_v12 }
 0x30a   :  { %v948_v20 = vmul.f32 %v1084_v5, %v939_v16  ;;  %v938_v13 = vmul.f32 0.33333334, %v936_v18 }
 0x30c   :  { %v957_v21 = vadd.f32 %v1085_v19, %v948_v20  ;;  %v947_v22 = vmul.f32 %v1084_v5, %v938_v13 }
 0x30e   :  { %959 = vst [vmem:[%s1809_s17 + $0x8] sm:$0xff] %v957_v21  ;;  %v956_v23 = vadd.f32 %v1085_v19, %v947_v22 }
 0x310   :  { %958 = vst [vmem:[%s1809_s17] sm:$0xff] %v956_v23 }

</bundles_post_ra>
